<compile_context>
chip_gen: v5e
topology: v5e:2x2
jax: 0.10.0
libtpu: 0.0.40
codegen_flags: <defaults>
</compile_context>

<pallas_src>
import numpy as np
import jax
import jax.numpy as jnp
from jax.experimental import pallas as pl
from jax.experimental.pallas import tpu as pltpu

INPUT_SIZE = 16
HIDDEN = 32
OUTPUT = 1
LAYERS = 4
SEQ = 8
HCAT = LAYERS * HIDDEN      # 128: all layers' hidden states packed along lanes
NGATES = 4 * HCAT           # 512: [ i_0..i_3 | f_0..f_3 | g_0..g_3 | o_0..o_3 ]


def lstm_kernel(x_ref, wih0_ref, wstack_ref, b_ref, wreg_ref, breg_ref,
                out_ref, htop_ref):
    """Whole LSTM + head, anti-diagonal wavefront, statically unrolled.

    State (register-resident jnp values, NOT refs):
      hcat (1,128): lanes [l*H,(l+1)*H) hold h_l of the most recent cell of
                    layer l that has been computed (zeros before it starts).
      ccat (1,128): same layout for the cell state c_l.
    All cells on diagonal d read the same hcat snapshot (their dependencies
    h_{l-1}(t) and h_l(t-1) both live on diagonal d-1), which is what makes
    the single stacked matmul per diagonal correct.
    """
    H = HIDDEN
    seq = x_ref.shape[0]
    n_diag = seq + LAYERS - 1

    # ---- hoisted off the recurrence critical path --------------------------
    # Layer-0 input projection for EVERY timestep: one (SEQ,16)@(16,512) pass.
    xg = jnp.dot(x_ref[...], wih0_ref[...],
                 preferred_element_type=jnp.float32)          # (SEQ, 512)
    bvec = b_ref[...]                                         # (1, 512)
    # Per-timestep additive term (bias + x-projection), pre-extracted rows so
    # the per-diagonal work is a single vector add.
    add_rows = [xg[t:t + 1, :] + bvec for t in range(seq)]
    lane = jax.lax.broadcasted_iota(jnp.int32, (1, HCAT), 1)  # lane index

    # ---- register-resident recurrent state ---------------------------------
    hcat = jnp.zeros((1, HCAT), jnp.float32)
    ccat = jnp.zeros((1, HCAT), jnp.float32)

    # ---- wavefront over diagonals d = t + l ---------------------------------
    for d in range(n_diag):                      # static unroll (11 steps)
        lo = max(0, d - seq + 1)                 # active layers lo..hi (static)
        hi = min(LAYERS - 1, d)

        if d == 0:
            gates = add_rows[0]                  # hcat == 0: skip the matmul
        else:
            gates = jnp.dot(hcat, wstack_ref[...],
                            preferred_element_type=jnp.float32)   # (1, 512)
            gates = gates + (add_rows[d] if d < seq else bvec)

        # One EUP tanh over all 512 gate lanes.  The 0.5 pre-scale for the
        # sigmoid gates is folded into the packed weights/bias, so
        # sigmoid(raw) == 0.5*tanh(gates) + 0.5 on the i/f/o blocks.
        tg = jnp.tanh(gates)
        gi = tg[:, 0 * HCAT:1 * HCAT] * 0.5 + 0.5   # full-vreg aligned slices
        gf = tg[:, 1 * HCAT:2 * HCAT] * 0.5 + 0.5
        gg = tg[:, 2 * HCAT:3 * HCAT]
        go = tg[:, 3 * HCAT:4 * HCAT] * 0.5 + 0.5

        c_new = gf * ccat + gi * gg                 # full 128-lane update
        h_new = go * jnp.tanh(c_new)

        if lo == 0 and hi == LAYERS - 1:
            # All layers active on this diagonal: no masking needed.
            ccat, hcat = c_new, h_new
        else:
            # Ramp-up / ramp-down: inactive layers keep their frozen state.
            conds = []
            if lo > 0:
                conds.append(lane >= lo * H)
            if hi < LAYERS - 1:
                conds.append(lane < (hi + 1) * H)
            active = conds[0] if len(conds) == 1 else jnp.logical_and(*conds)
            ccat = jnp.where(active, c_new, ccat)
            hcat = jnp.where(active, h_new, hcat)

        # Top layer produced h_{L-1}(t) with t = d - (LAYERS-1).  Full-lane
        # row store, off the recurrence chain (nothing reads htop_ref until
        # the head below).
        if d >= LAYERS - 1:
            htop_ref[pl.ds(d - (LAYERS - 1), 1), :] = hcat

    # ---- regression head: one matmul, one dense store -----------------------
    # wreg is zero-padded outside the top layer's lanes, so no lane slicing.
    out_ref[...] = (jnp.dot(htop_ref[...], wreg_ref[...],
                            preferred_element_type=jnp.float32)
                    + breg_ref[...])


def pack_params(params):
    """One-time (OUTSIDE the jit) repack of the raw LSTM parameters into the
    wavefront layout.  Column order is gate-major / layer-minor:
        new_col = gate*HCAT + layer*H + unit,   gate in (i,f,g,o)
    The 0.5 pre-scale of sigmoid(x)=0.5*tanh(0.5x)+0.5 is folded into the
    i/f/o columns of every weight and bias."""
    wih0, wih, whh, b, wreg, breg = (np.asarray(p, np.float32) for p in params)
    H = HIDDEN
    gate_scale = np.array([0.5, 0.5, 1.0, 0.5], np.float32)   # i, f, g, o

    def scale_gates(w):                     # (rows, 4H) -> (rows, 4, H), scaled
        return w.reshape(w.shape[0], 4, H) * gate_scale[None, :, None]

    # Stacked recurrent weight: hcat(128) -> all layers' gates(512).
    # Column block of layer l reads hcat rows of layer l-1 (W_ih) and l (W_hh).
    wstack = np.zeros((HCAT, 4, HCAT), np.float32)
    for l in range(LAYERS):
        wstack[l * H:(l + 1) * H, :, l * H:(l + 1) * H] = scale_gates(whh[l])
        if l > 0:
            wstack[(l - 1) * H:l * H, :, l * H:(l + 1) * H] = scale_gates(wih[l - 1])
    wstack = wstack.reshape(HCAT, NGATES)

    # Layer-0 input projection spread into the stacked column layout.
    wih0_spread = np.zeros((INPUT_SIZE, 4, HCAT), np.float32)
    wih0_spread[:, :, 0:H] = scale_gates(wih0)
    wih0_spread = wih0_spread.reshape(INPUT_SIZE, NGATES)

    # Combined biases, same column layout.
    bstack = (b.reshape(LAYERS, 4, H) * gate_scale[None, :, None]
              ).transpose(1, 0, 2).reshape(1, NGATES)

    # Regression head weight padded to read the top layer's lanes of hcat.
    wreg_pad = np.zeros((HCAT, OUTPUT), np.float32)
    wreg_pad[(LAYERS - 1) * H:LAYERS * H, :] = wreg

    return tuple(jnp.asarray(a) for a in
                 (wih0_spread, wstack, bstack, wreg_pad, breg))


@jax.jit
def lstm_forward(x, packed):
    wih0_spread, wstack, bstack, wreg_pad, breg = packed
    seq = x.shape[0]
    out = pl.pallas_call(
        lstm_kernel,
        out_shape=jax.ShapeDtypeStruct((seq, OUTPUT), jnp.float32),
        # No grid: the total footprint (~0.3 MiB) is VMEM-resident on every
        # TPU generation, so all operands live whole in VMEM (default specs)
        # and the recurrence runs with zero per-step pipeline overhead.
        scratch_shapes=[
            pltpu.VMEM((seq, HCAT), jnp.float32),   # top-layer h rows
        ],
    )(x, wih0_spread, wstack, bstack, wreg_pad, breg)
    return out.reshape(seq, 1, OUTPUT)   # matches torch: (s, b=1, output_size)


def init_params(key):
    """Deterministic synthetic parameters (PyTorch-style uniform init),
    stored transposed: (in_features, 4H) with column blocks [i|f|g|o]."""
    k = 1.0 / np.sqrt(HIDDEN)
    ks = jax.random.split(key, 6)
    wih0 = jax.random.uniform(ks[0], (INPUT_SIZE, 4 * HIDDEN), jnp.float32, -k, k)
    wih = jax.random.uniform(ks[1], (LAYERS - 1, HIDDEN, 4 * HIDDEN),
                             jnp.float32, -k, k)
    whh = jax.random.uniform(ks[2], (LAYERS, HIDDEN, 4 * HIDDEN),
                             jnp.float32, -k, k)
    # combined bias (b_ih + b_hh) per layer
    b = jax.random.uniform(ks[3], (LAYERS, 4 * HIDDEN), jnp.float32, -k, k)
    wreg = jax.random.uniform(ks[4], (HIDDEN, OUTPUT), jnp.float32, -k, k)
    breg = jax.random.uniform(ks[5], (1, OUTPUT), jnp.float32, -k, k)
    return wih0, wih, whh, b, wreg, breg


def reference(x, params):
    """Pure-JAX reference implementing the same LSTM + Linear semantics."""
    wih0, wih, whh, b, wreg, breg = params
    H = HIDDEN
    h = jnp.zeros((LAYERS, 1, H), jnp.float32)
    c = jnp.zeros((LAYERS, 1, H), jnp.float32)
    outs = []
    for t in range(x.shape[0]):
        inp = x[t:t + 1, :]
        for l in range(LAYERS):
            w_ih = wih0 if l == 0 else wih[l - 1]
            gates = inp @ w_ih + h[l] @ whh[l] + b[l:l + 1, :]
            i = jax.nn.sigmoid(gates[:, :H])
            f = jax.nn.sigmoid(gates[:, H:2 * H])
            g = jnp.tanh(gates[:, 2 * H:3 * H])
            o = jax.nn.sigmoid(gates[:, 3 * H:])
            c = c.at[l].set(f * c[l] + i * g)
            h = h.at[l].set(o * jnp.tanh(c[l]))
            inp = h[l]
        outs.append(inp @ wreg + breg)
    return jnp.stack(outs, axis=0)  # (seq, 1, OUTPUT)


if __name__ == "__main__":
    key = jax.random.PRNGKey(0)
    kx, kp = jax.random.split(key)
    # Input consistent with forward(): x.view(len(x), 1, -1) -> (seq, 1, input)
    x = jax.random.normal(kx, (SEQ, INPUT_SIZE), jnp.float32)
    params = init_params(kp)
    packed = pack_params(params)     # one-time pre-pack, outside the jit

    y = lstm_forward(x, packed)
    y = jax.block_until_ready(y)

    y_ref = reference(x, params)
    assert y.shape == (SEQ, 1, OUTPUT), y.shape
    # tanh-based sigmoid on the EUP vs exp-based reference: keep 1e-3 tol.
    np.testing.assert_allclose(np.asarray(y), np.asarray(y_ref),
                               rtol=1e-3, atol=1e-3)
    print("KERNEL_OK")
</pallas_src>

<mosaic_0001>
module attributes {stable_mosaic.version = 11 : i64} {
  func.func @lstm_kernel(%arg0: memref<8x16xf32, #tpu.memory_space<vmem>>, %arg1: memref<16x512xf32, #tpu.memory_space<vmem>>, %arg2: memref<128x512xf32, #tpu.memory_space<vmem>>, %arg3: memref<1x512xf32, #tpu.memory_space<vmem>>, %arg4: memref<128x1xf32, #tpu.memory_space<vmem>>, %arg5: memref<1x1xf32, #tpu.memory_space<vmem>>, %arg6: memref<8x1xf32, #tpu.memory_space<vmem>>, %arg7: memref<8x128xf32, #tpu.memory_space<vmem>>) attributes {dimension_semantics = [], scalar_prefetch = 0 : i64, scratch_operands = 1 : i64, tpu.core_type = #tpu.core_type<tc>} {
    %c0 = arith.constant 0 : index
    %c0_0 = arith.constant 0 : index
    %0 = vector.load %arg0[%c0, %c0_0] : memref<8x16xf32, #tpu.memory_space<vmem>>, vector<8x16xf32>
    %c0_1 = arith.constant 0 : index
    %c0_2 = arith.constant 0 : index
    %1 = vector.load %arg1[%c0_1, %c0_2] : memref<16x512xf32, #tpu.memory_space<vmem>>, vector<16x512xf32>
    %cst = arith.constant dense<0.000000e+00> : vector<8x512xf32>
    %2 = tpu.matmul %0, %1, %cst {dimension_numbers = #tpu.dot_dimension_numbers<[1], [0], [0], [1], [0, 0, 1, 1], [], []>} : vector<8x16xf32>, vector<16x512xf32>, vector<8x512xf32> -> vector<8x512xf32>
    %c0_3 = arith.constant 0 : index
    %c0_4 = arith.constant 0 : index
    %3 = vector.load %arg3[%c0_3, %c0_4] : memref<1x512xf32, #tpu.memory_space<vmem>>, vector<1x512xf32>
    %4 = vector.extract_strided_slice %2 {offsets = [0, 0], sizes = [1, 512], strides = [1, 1]} : vector<8x512xf32> to vector<1x512xf32>
    %5 = arith.addf %4, %3 : vector<1x512xf32>
    %6 = vector.extract_strided_slice %2 {offsets = [1, 0], sizes = [1, 512], strides = [1, 1]} : vector<8x512xf32> to vector<1x512xf32>
    %7 = arith.addf %6, %3 : vector<1x512xf32>
    %8 = vector.extract_strided_slice %2 {offsets = [2, 0], sizes = [1, 512], strides = [1, 1]} : vector<8x512xf32> to vector<1x512xf32>
    %9 = arith.addf %8, %3 : vector<1x512xf32>
    %10 = vector.extract_strided_slice %2 {offsets = [3, 0], sizes = [1, 512], strides = [1, 1]} : vector<8x512xf32> to vector<1x512xf32>
    %11 = arith.addf %10, %3 : vector<1x512xf32>
    %12 = vector.extract_strided_slice %2 {offsets = [4, 0], sizes = [1, 512], strides = [1, 1]} : vector<8x512xf32> to vector<1x512xf32>
    %13 = arith.addf %12, %3 : vector<1x512xf32>
    %14 = vector.extract_strided_slice %2 {offsets = [5, 0], sizes = [1, 512], strides = [1, 1]} : vector<8x512xf32> to vector<1x512xf32>
    %15 = arith.addf %14, %3 : vector<1x512xf32>
    %16 = vector.extract_strided_slice %2 {offsets = [6, 0], sizes = [1, 512], strides = [1, 1]} : vector<8x512xf32> to vector<1x512xf32>
    %17 = arith.addf %16, %3 : vector<1x512xf32>
    %18 = vector.extract_strided_slice %2 {offsets = [7, 0], sizes = [1, 512], strides = [1, 1]} : vector<8x512xf32> to vector<1x512xf32>
    %19 = arith.addf %18, %3 : vector<1x512xf32>
    %20 = tpu.iota {dimensions = array<i32: 1>} : vector<1x128xi32>
    %cst_5 = arith.constant 0.000000e+00 : f32
    %21 = vector.broadcast %cst_5 : f32 to vector<1x128xf32>
    %cst_6 = arith.constant 0.000000e+00 : f32
    %22 = vector.broadcast %cst_6 : f32 to vector<1x128xf32>
    %23 = math.tanh %5 : vector<1x512xf32>
    %24 = vector.extract_strided_slice %23 {offsets = [0, 0], sizes = [1, 128], strides = [1, 1]} : vector<1x512xf32> to vector<1x128xf32>
    %cst_7 = arith.constant 5.000000e-01 : f32
    %25 = vector.broadcast %cst_7 : f32 to vector<1x128xf32>
    %26 = arith.mulf %24, %25 : vector<1x128xf32>
    %cst_8 = arith.constant 5.000000e-01 : f32
    %27 = vector.broadcast %cst_8 : f32 to vector<1x128xf32>
    %28 = arith.addf %26, %27 : vector<1x128xf32>
    %29 = vector.extract_strided_slice %23 {offsets = [0, 128], sizes = [1, 128], strides = [1, 1]} : vector<1x512xf32> to vector<1x128xf32>
    %cst_9 = arith.constant 5.000000e-01 : f32
    %30 = vector.broadcast %cst_9 : f32 to vector<1x128xf32>
    %31 = arith.mulf %29, %30 : vector<1x128xf32>
    %cst_10 = arith.constant 5.000000e-01 : f32
    %32 = vector.broadcast %cst_10 : f32 to vector<1x128xf32>
    %33 = arith.addf %31, %32 : vector<1x128xf32>
    %34 = vector.extract_strided_slice %23 {offsets = [0, 256], sizes = [1, 128], strides = [1, 1]} : vector<1x512xf32> to vector<1x128xf32>
    %35 = vector.extract_strided_slice %23 {offsets = [0, 384], sizes = [1, 128], strides = [1, 1]} : vector<1x512xf32> to vector<1x128xf32>
    %cst_11 = arith.constant 5.000000e-01 : f32
    %36 = vector.broadcast %cst_11 : f32 to vector<1x128xf32>
    %37 = arith.mulf %35, %36 : vector<1x128xf32>
    %cst_12 = arith.constant 5.000000e-01 : f32
    %38 = vector.broadcast %cst_12 : f32 to vector<1x128xf32>
    %39 = arith.addf %37, %38 : vector<1x128xf32>
    %40 = arith.mulf %33, %22 : vector<1x128xf32>
    %41 = arith.mulf %28, %34 : vector<1x128xf32>
    %42 = arith.addf %40, %41 : vector<1x128xf32>
    %43 = math.tanh %42 : vector<1x128xf32>
    %44 = arith.mulf %39, %43 : vector<1x128xf32>
    %c32_i32 = arith.constant 32 : i32
    %45 = vector.broadcast %c32_i32 : i32 to vector<1x128xi32>
    %46 = arith.cmpi slt, %20, %45 : vector<1x128xi32>
    %47 = arith.select %46, %42, %22 : vector<1x128xi1>, vector<1x128xf32>
    %48 = arith.select %46, %44, %21 : vector<1x128xi1>, vector<1x128xf32>
    %c0_13 = arith.constant 0 : index
    %c0_14 = arith.constant 0 : index
    %49 = vector.load %arg2[%c0_13, %c0_14] : memref<128x512xf32, #tpu.memory_space<vmem>>, vector<128x512xf32>
    %cst_15 = arith.constant dense<0.000000e+00> : vector<1x512xf32>
    %50 = tpu.matmul %48, %49, %cst_15 {dimension_numbers = #tpu.dot_dimension_numbers<[1], [0], [0], [1], [0, 0, 1, 1], [], []>} : vector<1x128xf32>, vector<128x512xf32>, vector<1x512xf32> -> vector<1x512xf32>
    %51 = arith.addf %50, %7 : vector<1x512xf32>
    %52 = math.tanh %51 : vector<1x512xf32>
    %53 = vector.extract_strided_slice %52 {offsets = [0, 0], sizes = [1, 128], strides = [1, 1]} : vector<1x512xf32> to vector<1x128xf32>
    %cst_16 = arith.constant 5.000000e-01 : f32
    %54 = vector.broadcast %cst_16 : f32 to vector<1x128xf32>
    %55 = arith.mulf %53, %54 : vector<1x128xf32>
    %cst_17 = arith.constant 5.000000e-01 : f32
    %56 = vector.broadcast %cst_17 : f32 to vector<1x128xf32>
    %57 = arith.addf %55, %56 : vector<1x128xf32>
    %58 = vector.extract_strided_slice %52 {offsets = [0, 128], sizes = [1, 128], strides = [1, 1]} : vector<1x512xf32> to vector<1x128xf32>
    %cst_18 = arith.constant 5.000000e-01 : f32
    %59 = vector.broadcast %cst_18 : f32 to vector<1x128xf32>
    %60 = arith.mulf %58, %59 : vector<1x128xf32>
    %cst_19 = arith.constant 5.000000e-01 : f32
    %61 = vector.broadcast %cst_19 : f32 to vector<1x128xf32>
    %62 = arith.addf %60, %61 : vector<1x128xf32>
    %63 = vector.extract_strided_slice %52 {offsets = [0, 256], sizes = [1, 128], strides = [1, 1]} : vector<1x512xf32> to vector<1x128xf32>
    %64 = vector.extract_strided_slice %52 {offsets = [0, 384], sizes = [1, 128], strides = [1, 1]} : vector<1x512xf32> to vector<1x128xf32>
    %cst_20 = arith.constant 5.000000e-01 : f32
    %65 = vector.broadcast %cst_20 : f32 to vector<1x128xf32>
    %66 = arith.mulf %64, %65 : vector<1x128xf32>
    %cst_21 = arith.constant 5.000000e-01 : f32
    %67 = vector.broadcast %cst_21 : f32 to vector<1x128xf32>
    %68 = arith.addf %66, %67 : vector<1x128xf32>
    %69 = arith.mulf %62, %47 : vector<1x128xf32>
    %70 = arith.mulf %57, %63 : vector<1x128xf32>
    %71 = arith.addf %69, %70 : vector<1x128xf32>
    %72 = math.tanh %71 : vector<1x128xf32>
    %73 = arith.mulf %68, %72 : vector<1x128xf32>
    %c64_i32 = arith.constant 64 : i32
    %74 = vector.broadcast %c64_i32 : i32 to vector<1x128xi32>
    %75 = arith.cmpi slt, %20, %74 : vector<1x128xi32>
    %76 = arith.select %75, %71, %47 : vector<1x128xi1>, vector<1x128xf32>
    %77 = arith.select %75, %73, %48 : vector<1x128xi1>, vector<1x128xf32>
    %c0_22 = arith.constant 0 : index
    %c0_23 = arith.constant 0 : index
    %78 = vector.load %arg2[%c0_22, %c0_23] : memref<128x512xf32, #tpu.memory_space<vmem>>, vector<128x512xf32>
    %cst_24 = arith.constant dense<0.000000e+00> : vector<1x512xf32>
    %79 = tpu.matmul %77, %78, %cst_24 {dimension_numbers = #tpu.dot_dimension_numbers<[1], [0], [0], [1], [0, 0, 1, 1], [], []>} : vector<1x128xf32>, vector<128x512xf32>, vector<1x512xf32> -> vector<1x512xf32>
    %80 = arith.addf %79, %9 : vector<1x512xf32>
    %81 = math.tanh %80 : vector<1x512xf32>
    %82 = vector.extract_strided_slice %81 {offsets = [0, 0], sizes = [1, 128], strides = [1, 1]} : vector<1x512xf32> to vector<1x128xf32>
    %cst_25 = arith.constant 5.000000e-01 : f32
    %83 = vector.broadcast %cst_25 : f32 to vector<1x128xf32>
    %84 = arith.mulf %82, %83 : vector<1x128xf32>
    %cst_26 = arith.constant 5.000000e-01 : f32
    %85 = vector.broadcast %cst_26 : f32 to vector<1x128xf32>
    %86 = arith.addf %84, %85 : vector<1x128xf32>
    %87 = vector.extract_strided_slice %81 {offsets = [0, 128], sizes = [1, 128], strides = [1, 1]} : vector<1x512xf32> to vector<1x128xf32>
    %cst_27 = arith.constant 5.000000e-01 : f32
    %88 = vector.broadcast %cst_27 : f32 to vector<1x128xf32>
    %89 = arith.mulf %87, %88 : vector<1x128xf32>
    %cst_28 = arith.constant 5.000000e-01 : f32
    %90 = vector.broadcast %cst_28 : f32 to vector<1x128xf32>
    %91 = arith.addf %89, %90 : vector<1x128xf32>
    %92 = vector.extract_strided_slice %81 {offsets = [0, 256], sizes = [1, 128], strides = [1, 1]} : vector<1x512xf32> to vector<1x128xf32>
    %93 = vector.extract_strided_slice %81 {offsets = [0, 384], sizes = [1, 128], strides = [1, 1]} : vector<1x512xf32> to vector<1x128xf32>
    %cst_29 = arith.constant 5.000000e-01 : f32
    %94 = vector.broadcast %cst_29 : f32 to vector<1x128xf32>
    %95 = arith.mulf %93, %94 : vector<1x128xf32>
    %cst_30 = arith.constant 5.000000e-01 : f32
    %96 = vector.broadcast %cst_30 : f32 to vector<1x128xf32>
    %97 = arith.addf %95, %96 : vector<1x128xf32>
    %98 = arith.mulf %91, %76 : vector<1x128xf32>
    %99 = arith.mulf %86, %92 : vector<1x128xf32>
    %100 = arith.addf %98, %99 : vector<1x128xf32>
    %101 = math.tanh %100 : vector<1x128xf32>
    %102 = arith.mulf %97, %101 : vector<1x128xf32>
    %c96_i32 = arith.constant 96 : i32
    %103 = vector.broadcast %c96_i32 : i32 to vector<1x128xi32>
    %104 = arith.cmpi slt, %20, %103 : vector<1x128xi32>
    %105 = arith.select %104, %100, %76 : vector<1x128xi1>, vector<1x128xf32>
    %106 = arith.select %104, %102, %77 : vector<1x128xi1>, vector<1x128xf32>
    %c0_31 = arith.constant 0 : index
    %c0_32 = arith.constant 0 : index
    %107 = vector.load %arg2[%c0_31, %c0_32] : memref<128x512xf32, #tpu.memory_space<vmem>>, vector<128x512xf32>
    %cst_33 = arith.constant dense<0.000000e+00> : vector<1x512xf32>
    %108 = tpu.matmul %106, %107, %cst_33 {dimension_numbers = #tpu.dot_dimension_numbers<[1], [0], [0], [1], [0, 0, 1, 1], [], []>} : vector<1x128xf32>, vector<128x512xf32>, vector<1x512xf32> -> vector<1x512xf32>
    %109 = arith.addf %108, %11 : vector<1x512xf32>
    %110 = math.tanh %109 : vector<1x512xf32>
    %111 = vector.extract_strided_slice %110 {offsets = [0, 0], sizes = [1, 128], strides = [1, 1]} : vector<1x512xf32> to vector<1x128xf32>
    %cst_34 = arith.constant 5.000000e-01 : f32
    %112 = vector.broadcast %cst_34 : f32 to vector<1x128xf32>
    %113 = arith.mulf %111, %112 : vector<1x128xf32>
    %cst_35 = arith.constant 5.000000e-01 : f32
    %114 = vector.broadcast %cst_35 : f32 to vector<1x128xf32>
    %115 = arith.addf %113, %114 : vector<1x128xf32>
    %116 = vector.extract_strided_slice %110 {offsets = [0, 128], sizes = [1, 128], strides = [1, 1]} : vector<1x512xf32> to vector<1x128xf32>
    %cst_36 = arith.constant 5.000000e-01 : f32
    %117 = vector.broadcast %cst_36 : f32 to vector<1x128xf32>
    %118 = arith.mulf %116, %117 : vector<1x128xf32>
    %cst_37 = arith.constant 5.000000e-01 : f32
    %119 = vector.broadcast %cst_37 : f32 to vector<1x128xf32>
    %120 = arith.addf %118, %119 : vector<1x128xf32>
    %121 = vector.extract_strided_slice %110 {offsets = [0, 256], sizes = [1, 128], strides = [1, 1]} : vector<1x512xf32> to vector<1x128xf32>
    %122 = vector.extract_strided_slice %110 {offsets = [0, 384], sizes = [1, 128], strides = [1, 1]} : vector<1x512xf32> to vector<1x128xf32>
    %cst_38 = arith.constant 5.000000e-01 : f32
    %123 = vector.broadcast %cst_38 : f32 to vector<1x128xf32>
    %124 = arith.mulf %122, %123 : vector<1x128xf32>
    %cst_39 = arith.constant 5.000000e-01 : f32
    %125 = vector.broadcast %cst_39 : f32 to vector<1x128xf32>
    %126 = arith.addf %124, %125 : vector<1x128xf32>
    %127 = arith.mulf %120, %105 : vector<1x128xf32>
    %128 = arith.mulf %115, %121 : vector<1x128xf32>
    %129 = arith.addf %127, %128 : vector<1x128xf32>
    %130 = math.tanh %129 : vector<1x128xf32>
    %131 = arith.mulf %126, %130 : vector<1x128xf32>
    %c0_40 = arith.constant 0 : index
    %c0_41 = arith.constant 0 : index
    %132 = vector.load %arg7[%c0_40, %c0_41] : memref<8x128xf32, #tpu.memory_space<vmem>>, vector<1x128xf32>
    tpu.vector_store %arg7[%c0_40, %c0_41], %131 {strides = array<i32>} : memref<8x128xf32, #tpu.memory_space<vmem>>, vector<1x128xf32>,
    %c0_42 = arith.constant 0 : index
    %c0_43 = arith.constant 0 : index
    %133 = vector.load %arg2[%c0_42, %c0_43] : memref<128x512xf32, #tpu.memory_space<vmem>>, vector<128x512xf32>
    %cst_44 = arith.constant dense<0.000000e+00> : vector<1x512xf32>
    %134 = tpu.matmul %131, %133, %cst_44 {dimension_numbers = #tpu.dot_dimension_numbers<[1], [0], [0], [1], [0, 0, 1, 1], [], []>} : vector<1x128xf32>, vector<128x512xf32>, vector<1x512xf32> -> vector<1x512xf32>
    %135 = arith.addf %134, %13 : vector<1x512xf32>
    %136 = math.tanh %135 : vector<1x512xf32>
    %137 = vector.extract_strided_slice %136 {offsets = [0, 0], sizes = [1, 128], strides = [1, 1]} : vector<1x512xf32> to vector<1x128xf32>
    %cst_45 = arith.constant 5.000000e-01 : f32
    %138 = vector.broadcast %cst_45 : f32 to vector<1x128xf32>
    %139 = arith.mulf %137, %138 : vector<1x128xf32>
    %cst_46 = arith.constant 5.000000e-01 : f32
    %140 = vector.broadcast %cst_46 : f32 to vector<1x128xf32>
    %141 = arith.addf %139, %140 : vector<1x128xf32>
    %142 = vector.extract_strided_slice %136 {offsets = [0, 128], sizes = [1, 128], strides = [1, 1]} : vector<1x512xf32> to vector<1x128xf32>
    %cst_47 = arith.constant 5.000000e-01 : f32
    %143 = vector.broadcast %cst_47 : f32 to vector<1x128xf32>
    %144 = arith.mulf %142, %143 : vector<1x128xf32>
    %cst_48 = arith.constant 5.000000e-01 : f32
    %145 = vector.broadcast %cst_48 : f32 to vector<1x128xf32>
    %146 = arith.addf %144, %145 : vector<1x128xf32>
    %147 = vector.extract_strided_slice %136 {offsets = [0, 256], sizes = [1, 128], strides = [1, 1]} : vector<1x512xf32> to vector<1x128xf32>
    %148 = vector.extract_strided_slice %136 {offsets = [0, 384], sizes = [1, 128], strides = [1, 1]} : vector<1x512xf32> to vector<1x128xf32>
    %cst_49 = arith.constant 5.000000e-01 : f32
    %149 = vector.broadcast %cst_49 : f32 to vector<1x128xf32>
    %150 = arith.mulf %148, %149 : vector<1x128xf32>
    %cst_50 = arith.constant 5.000000e-01 : f32
    %151 = vector.broadcast %cst_50 : f32 to vector<1x128xf32>
    %152 = arith.addf %150, %151 : vector<1x128xf32>
    %153 = arith.mulf %146, %129 : vector<1x128xf32>
    %154 = arith.mulf %141, %147 : vector<1x128xf32>
    %155 = arith.addf %153, %154 : vector<1x128xf32>
    %156 = math.tanh %155 : vector<1x128xf32>
    %157 = arith.mulf %152, %156 : vector<1x128xf32>
    %c1 = arith.constant 1 : index
    %c0_51 = arith.constant 0 : index
    %158 = vector.load %arg7[%c1, %c0_51] : memref<8x128xf32, #tpu.memory_space<vmem>>, vector<1x128xf32>
    tpu.vector_store %arg7[%c1, %c0_51], %157 {strides = array<i32>} : memref<8x128xf32, #tpu.memory_space<vmem>>, vector<1x128xf32>,
    %c0_52 = arith.constant 0 : index
    %c0_53 = arith.constant 0 : index
    %159 = vector.load %arg2[%c0_52, %c0_53] : memref<128x512xf32, #tpu.memory_space<vmem>>, vector<128x512xf32>
    %cst_54 = arith.constant dense<0.000000e+00> : vector<1x512xf32>
    %160 = tpu.matmul %157, %159, %cst_54 {dimension_numbers = #tpu.dot_dimension_numbers<[1], [0], [0], [1], [0, 0, 1, 1], [], []>} : vector<1x128xf32>, vector<128x512xf32>, vector<1x512xf32> -> vector<1x512xf32>
    %161 = arith.addf %160, %15 : vector<1x512xf32>
    %162 = math.tanh %161 : vector<1x512xf32>
    %163 = vector.extract_strided_slice %162 {offsets = [0, 0], sizes = [1, 128], strides = [1, 1]} : vector<1x512xf32> to vector<1x128xf32>
    %cst_55 = arith.constant 5.000000e-01 : f32
    %164 = vector.broadcast %cst_55 : f32 to vector<1x128xf32>
    %165 = arith.mulf %163, %164 : vector<1x128xf32>
    %cst_56 = arith.constant 5.000000e-01 : f32
    %166 = vector.broadcast %cst_56 : f32 to vector<1x128xf32>
    %167 = arith.addf %165, %166 : vector<1x128xf32>
    %168 = vector.extract_strided_slice %162 {offsets = [0, 128], sizes = [1, 128], strides = [1, 1]} : vector<1x512xf32> to vector<1x128xf32>
    %cst_57 = arith.constant 5.000000e-01 : f32
    %169 = vector.broadcast %cst_57 : f32 to vector<1x128xf32>
    %170 = arith.mulf %168, %169 : vector<1x128xf32>
    %cst_58 = arith.constant 5.000000e-01 : f32
    %171 = vector.broadcast %cst_58 : f32 to vector<1x128xf32>
    %172 = arith.addf %170, %171 : vector<1x128xf32>
    %173 = vector.extract_strided_slice %162 {offsets = [0, 256], sizes = [1, 128], strides = [1, 1]} : vector<1x512xf32> to vector<1x128xf32>
    %174 = vector.extract_strided_slice %162 {offsets = [0, 384], sizes = [1, 128], strides = [1, 1]} : vector<1x512xf32> to vector<1x128xf32>
    %cst_59 = arith.constant 5.000000e-01 : f32
    %175 = vector.broadcast %cst_59 : f32 to vector<1x128xf32>
    %176 = arith.mulf %174, %175 : vector<1x128xf32>
    %cst_60 = arith.constant 5.000000e-01 : f32
    %177 = vector.broadcast %cst_60 : f32 to vector<1x128xf32>
    %178 = arith.addf %176, %177 : vector<1x128xf32>
    %179 = arith.mulf %172, %155 : vector<1x128xf32>
    %180 = arith.mulf %167, %173 : vector<1x128xf32>
    %181 = arith.addf %179, %180 : vector<1x128xf32>
    %182 = math.tanh %181 : vector<1x128xf32>
    %183 = arith.mulf %178, %182 : vector<1x128xf32>
    %c2 = arith.constant 2 : index
    %c0_61 = arith.constant 0 : index
    %184 = vector.load %arg7[%c2, %c0_61] : memref<8x128xf32, #tpu.memory_space<vmem>>, vector<1x128xf32>
    tpu.vector_store %arg7[%c2, %c0_61], %183 {strides = array<i32>} : memref<8x128xf32, #tpu.memory_space<vmem>>, vector<1x128xf32>,
    %c0_62 = arith.constant 0 : index
    %c0_63 = arith.constant 0 : index
    %185 = vector.load %arg2[%c0_62, %c0_63] : memref<128x512xf32, #tpu.memory_space<vmem>>, vector<128x512xf32>
    %cst_64 = arith.constant dense<0.000000e+00> : vector<1x512xf32>
    %186 = tpu.matmul %183, %185, %cst_64 {dimension_numbers = #tpu.dot_dimension_numbers<[1], [0], [0], [1], [0, 0, 1, 1], [], []>} : vector<1x128xf32>, vector<128x512xf32>, vector<1x512xf32> -> vector<1x512xf32>
    %187 = arith.addf %186, %17 : vector<1x512xf32>
    %188 = math.tanh %187 : vector<1x512xf32>
    %189 = vector.extract_strided_slice %188 {offsets = [0, 0], sizes = [1, 128], strides = [1, 1]} : vector<1x512xf32> to vector<1x128xf32>
    %cst_65 = arith.constant 5.000000e-01 : f32
    %190 = vector.broadcast %cst_65 : f32 to vector<1x128xf32>
    %191 = arith.mulf %189, %190 : vector<1x128xf32>
    %cst_66 = arith.constant 5.000000e-01 : f32
    %192 = vector.broadcast %cst_66 : f32 to vector<1x128xf32>
    %193 = arith.addf %191, %192 : vector<1x128xf32>
    %194 = vector.extract_strided_slice %188 {offsets = [0, 128], sizes = [1, 128], strides = [1, 1]} : vector<1x512xf32> to vector<1x128xf32>
    %cst_67 = arith.constant 5.000000e-01 : f32
    %195 = vector.broadcast %cst_67 : f32 to vector<1x128xf32>
    %196 = arith.mulf %194, %195 : vector<1x128xf32>
    %cst_68 = arith.constant 5.000000e-01 : f32
    %197 = vector.broadcast %cst_68 : f32 to vector<1x128xf32>
    %198 = arith.addf %196, %197 : vector<1x128xf32>
    %199 = vector.extract_strided_slice %188 {offsets = [0, 256], sizes = [1, 128], strides = [1, 1]} : vector<1x512xf32> to vector<1x128xf32>
    %200 = vector.extract_strided_slice %188 {offsets = [0, 384], sizes = [1, 128], strides = [1, 1]} : vector<1x512xf32> to vector<1x128xf32>
    %cst_69 = arith.constant 5.000000e-01 : f32
    %201 = vector.broadcast %cst_69 : f32 to vector<1x128xf32>
    %202 = arith.mulf %200, %201 : vector<1x128xf32>
    %cst_70 = arith.constant 5.000000e-01 : f32
    %203 = vector.broadcast %cst_70 : f32 to vector<1x128xf32>
    %204 = arith.addf %202, %203 : vector<1x128xf32>
    %205 = arith.mulf %198, %181 : vector<1x128xf32>
    %206 = arith.mulf %193, %199 : vector<1x128xf32>
    %207 = arith.addf %205, %206 : vector<1x128xf32>
    %208 = math.tanh %207 : vector<1x128xf32>
    %209 = arith.mulf %204, %208 : vector<1x128xf32>
    %c3 = arith.constant 3 : index
    %c0_71 = arith.constant 0 : index
    %210 = vector.load %arg7[%c3, %c0_71] : memref<8x128xf32, #tpu.memory_space<vmem>>, vector<1x128xf32>
    tpu.vector_store %arg7[%c3, %c0_71], %209 {strides = array<i32>} : memref<8x128xf32, #tpu.memory_space<vmem>>, vector<1x128xf32>,
    %c0_72 = arith.constant 0 : index
    %c0_73 = arith.constant 0 : index
    %211 = vector.load %arg2[%c0_72, %c0_73] : memref<128x512xf32, #tpu.memory_space<vmem>>, vector<128x512xf32>
    %cst_74 = arith.constant dense<0.000000e+00> : vector<1x512xf32>
    %212 = tpu.matmul %209, %211, %cst_74 {dimension_numbers = #tpu.dot_dimension_numbers<[1], [0], [0], [1], [0, 0, 1, 1], [], []>} : vector<1x128xf32>, vector<128x512xf32>, vector<1x512xf32> -> vector<1x512xf32>
    %213 = arith.addf %212, %19 : vector<1x512xf32>
    %214 = math.tanh %213 : vector<1x512xf32>
    %215 = vector.extract_strided_slice %214 {offsets = [0, 0], sizes = [1, 128], strides = [1, 1]} : vector<1x512xf32> to vector<1x128xf32>
    %cst_75 = arith.constant 5.000000e-01 : f32
    %216 = vector.broadcast %cst_75 : f32 to vector<1x128xf32>
    %217 = arith.mulf %215, %216 : vector<1x128xf32>
    %cst_76 = arith.constant 5.000000e-01 : f32
    %218 = vector.broadcast %cst_76 : f32 to vector<1x128xf32>
    %219 = arith.addf %217, %218 : vector<1x128xf32>
    %220 = vector.extract_strided_slice %214 {offsets = [0, 128], sizes = [1, 128], strides = [1, 1]} : vector<1x512xf32> to vector<1x128xf32>
    %cst_77 = arith.constant 5.000000e-01 : f32
    %221 = vector.broadcast %cst_77 : f32 to vector<1x128xf32>
    %222 = arith.mulf %220, %221 : vector<1x128xf32>
    %cst_78 = arith.constant 5.000000e-01 : f32
    %223 = vector.broadcast %cst_78 : f32 to vector<1x128xf32>
    %224 = arith.addf %222, %223 : vector<1x128xf32>
    %225 = vector.extract_strided_slice %214 {offsets = [0, 256], sizes = [1, 128], strides = [1, 1]} : vector<1x512xf32> to vector<1x128xf32>
    %226 = vector.extract_strided_slice %214 {offsets = [0, 384], sizes = [1, 128], strides = [1, 1]} : vector<1x512xf32> to vector<1x128xf32>
    %cst_79 = arith.constant 5.000000e-01 : f32
    %227 = vector.broadcast %cst_79 : f32 to vector<1x128xf32>
    %228 = arith.mulf %226, %227 : vector<1x128xf32>
    %cst_80 = arith.constant 5.000000e-01 : f32
    %229 = vector.broadcast %cst_80 : f32 to vector<1x128xf32>
    %230 = arith.addf %228, %229 : vector<1x128xf32>
    %231 = arith.mulf %224, %207 : vector<1x128xf32>
    %232 = arith.mulf %219, %225 : vector<1x128xf32>
    %233 = arith.addf %231, %232 : vector<1x128xf32>
    %234 = math.tanh %233 : vector<1x128xf32>
    %235 = arith.mulf %230, %234 : vector<1x128xf32>
    %c4 = arith.constant 4 : index
    %c0_81 = arith.constant 0 : index
    %236 = vector.load %arg7[%c4, %c0_81] : memref<8x128xf32, #tpu.memory_space<vmem>>, vector<1x128xf32>
    tpu.vector_store %arg7[%c4, %c0_81], %235 {strides = array<i32>} : memref<8x128xf32, #tpu.memory_space<vmem>>, vector<1x128xf32>,
    %c0_82 = arith.constant 0 : index
    %c0_83 = arith.constant 0 : index
    %237 = vector.load %arg2[%c0_82, %c0_83] : memref<128x512xf32, #tpu.memory_space<vmem>>, vector<128x512xf32>
    %cst_84 = arith.constant dense<0.000000e+00> : vector<1x512xf32>
    %238 = tpu.matmul %235, %237, %cst_84 {dimension_numbers = #tpu.dot_dimension_numbers<[1], [0], [0], [1], [0, 0, 1, 1], [], []>} : vector<1x128xf32>, vector<128x512xf32>, vector<1x512xf32> -> vector<1x512xf32>
    %239 = arith.addf %238, %3 : vector<1x512xf32>
    %240 = math.tanh %239 : vector<1x512xf32>
    %241 = vector.extract_strided_slice %240 {offsets = [0, 0], sizes = [1, 128], strides = [1, 1]} : vector<1x512xf32> to vector<1x128xf32>
    %cst_85 = arith.constant 5.000000e-01 : f32
    %242 = vector.broadcast %cst_85 : f32 to vector<1x128xf32>
    %243 = arith.mulf %241, %242 : vector<1x128xf32>
    %cst_86 = arith.constant 5.000000e-01 : f32
    %244 = vector.broadcast %cst_86 : f32 to vector<1x128xf32>
    %245 = arith.addf %243, %244 : vector<1x128xf32>
    %246 = vector.extract_strided_slice %240 {offsets = [0, 128], sizes = [1, 128], strides = [1, 1]} : vector<1x512xf32> to vector<1x128xf32>
    %cst_87 = arith.constant 5.000000e-01 : f32
    %247 = vector.broadcast %cst_87 : f32 to vector<1x128xf32>
    %248 = arith.mulf %246, %247 : vector<1x128xf32>
    %cst_88 = arith.constant 5.000000e-01 : f32
    %249 = vector.broadcast %cst_88 : f32 to vector<1x128xf32>
    %250 = arith.addf %248, %249 : vector<1x128xf32>
    %251 = vector.extract_strided_slice %240 {offsets = [0, 256], sizes = [1, 128], strides = [1, 1]} : vector<1x512xf32> to vector<1x128xf32>
    %252 = vector.extract_strided_slice %240 {offsets = [0, 384], sizes = [1, 128], strides = [1, 1]} : vector<1x512xf32> to vector<1x128xf32>
    %cst_89 = arith.constant 5.000000e-01 : f32
    %253 = vector.broadcast %cst_89 : f32 to vector<1x128xf32>
    %254 = arith.mulf %252, %253 : vector<1x128xf32>
    %cst_90 = arith.constant 5.000000e-01 : f32
    %255 = vector.broadcast %cst_90 : f32 to vector<1x128xf32>
    %256 = arith.addf %254, %255 : vector<1x128xf32>
    %257 = arith.mulf %250, %233 : vector<1x128xf32>
    %258 = arith.mulf %245, %251 : vector<1x128xf32>
    %259 = arith.addf %257, %258 : vector<1x128xf32>
    %260 = math.tanh %259 : vector<1x128xf32>
    %261 = arith.mulf %256, %260 : vector<1x128xf32>
    %c32_i32_91 = arith.constant 32 : i32
    %262 = vector.broadcast %c32_i32_91 : i32 to vector<1x128xi32>
    %263 = arith.cmpi sge, %20, %262 : vector<1x128xi32>
    %264 = arith.select %263, %259, %233 : vector<1x128xi1>, vector<1x128xf32>
    %265 = arith.select %263, %261, %235 : vector<1x128xi1>, vector<1x128xf32>
    %c5 = arith.constant 5 : index
    %c0_92 = arith.constant 0 : index
    %266 = vector.load %arg7[%c5, %c0_92] : memref<8x128xf32, #tpu.memory_space<vmem>>, vector<1x128xf32>
    tpu.vector_store %arg7[%c5, %c0_92], %265 {strides = array<i32>} : memref<8x128xf32, #tpu.memory_space<vmem>>, vector<1x128xf32>,
    %c0_93 = arith.constant 0 : index
    %c0_94 = arith.constant 0 : index
    %267 = vector.load %arg2[%c0_93, %c0_94] : memref<128x512xf32, #tpu.memory_space<vmem>>, vector<128x512xf32>
    %cst_95 = arith.constant dense<0.000000e+00> : vector<1x512xf32>
    %268 = tpu.matmul %265, %267, %cst_95 {dimension_numbers = #tpu.dot_dimension_numbers<[1], [0], [0], [1], [0, 0, 1, 1], [], []>} : vector<1x128xf32>, vector<128x512xf32>, vector<1x512xf32> -> vector<1x512xf32>
    %269 = arith.addf %268, %3 : vector<1x512xf32>
    %270 = math.tanh %269 : vector<1x512xf32>
    %271 = vector.extract_strided_slice %270 {offsets = [0, 0], sizes = [1, 128], strides = [1, 1]} : vector<1x512xf32> to vector<1x128xf32>
    %cst_96 = arith.constant 5.000000e-01 : f32
    %272 = vector.broadcast %cst_96 : f32 to vector<1x128xf32>
    %273 = arith.mulf %271, %272 : vector<1x128xf32>
    %cst_97 = arith.constant 5.000000e-01 : f32
    %274 = vector.broadcast %cst_97 : f32 to vector<1x128xf32>
    %275 = arith.addf %273, %274 : vector<1x128xf32>
    %276 = vector.extract_strided_slice %270 {offsets = [0, 128], sizes = [1, 128], strides = [1, 1]} : vector<1x512xf32> to vector<1x128xf32>
    %cst_98 = arith.constant 5.000000e-01 : f32
    %277 = vector.broadcast %cst_98 : f32 to vector<1x128xf32>
    %278 = arith.mulf %276, %277 : vector<1x128xf32>
    %cst_99 = arith.constant 5.000000e-01 : f32
    %279 = vector.broadcast %cst_99 : f32 to vector<1x128xf32>
    %280 = arith.addf %278, %279 : vector<1x128xf32>
    %281 = vector.extract_strided_slice %270 {offsets = [0, 256], sizes = [1, 128], strides = [1, 1]} : vector<1x512xf32> to vector<1x128xf32>
    %282 = vector.extract_strided_slice %270 {offsets = [0, 384], sizes = [1, 128], strides = [1, 1]} : vector<1x512xf32> to vector<1x128xf32>
    %cst_100 = arith.constant 5.000000e-01 : f32
    %283 = vector.broadcast %cst_100 : f32 to vector<1x128xf32>
    %284 = arith.mulf %282, %283 : vector<1x128xf32>
    %cst_101 = arith.constant 5.000000e-01 : f32
    %285 = vector.broadcast %cst_101 : f32 to vector<1x128xf32>
    %286 = arith.addf %284, %285 : vector<1x128xf32>
    %287 = arith.mulf %280, %264 : vector<1x128xf32>
    %288 = arith.mulf %275, %281 : vector<1x128xf32>
    %289 = arith.addf %287, %288 : vector<1x128xf32>
    %290 = math.tanh %289 : vector<1x128xf32>
    %291 = arith.mulf %286, %290 : vector<1x128xf32>
    %c64_i32_102 = arith.constant 64 : i32
    %292 = vector.broadcast %c64_i32_102 : i32 to vector<1x128xi32>
    %293 = arith.cmpi sge, %20, %292 : vector<1x128xi32>
    %294 = arith.select %293, %289, %264 : vector<1x128xi1>, vector<1x128xf32>
    %295 = arith.select %293, %291, %265 : vector<1x128xi1>, vector<1x128xf32>
    %c6 = arith.constant 6 : index
    %c0_103 = arith.constant 0 : index
    %296 = vector.load %arg7[%c6, %c0_103] : memref<8x128xf32, #tpu.memory_space<vmem>>, vector<1x128xf32>
    tpu.vector_store %arg7[%c6, %c0_103], %295 {strides = array<i32>} : memref<8x128xf32, #tpu.memory_space<vmem>>, vector<1x128xf32>,
    %c0_104 = arith.constant 0 : index
    %c0_105 = arith.constant 0 : index
    %297 = vector.load %arg2[%c0_104, %c0_105] : memref<128x512xf32, #tpu.memory_space<vmem>>, vector<128x512xf32>
    %cst_106 = arith.constant dense<0.000000e+00> : vector<1x512xf32>
    %298 = tpu.matmul %295, %297, %cst_106 {dimension_numbers = #tpu.dot_dimension_numbers<[1], [0], [0], [1], [0, 0, 1, 1], [], []>} : vector<1x128xf32>, vector<128x512xf32>, vector<1x512xf32> -> vector<1x512xf32>
    %299 = arith.addf %298, %3 : vector<1x512xf32>
    %300 = math.tanh %299 : vector<1x512xf32>
    %301 = vector.extract_strided_slice %300 {offsets = [0, 0], sizes = [1, 128], strides = [1, 1]} : vector<1x512xf32> to vector<1x128xf32>
    %cst_107 = arith.constant 5.000000e-01 : f32
    %302 = vector.broadcast %cst_107 : f32 to vector<1x128xf32>
    %303 = arith.mulf %301, %302 : vector<1x128xf32>
    %cst_108 = arith.constant 5.000000e-01 : f32
    %304 = vector.broadcast %cst_108 : f32 to vector<1x128xf32>
    %305 = arith.addf %303, %304 : vector<1x128xf32>
    %306 = vector.extract_strided_slice %300 {offsets = [0, 128], sizes = [1, 128], strides = [1, 1]} : vector<1x512xf32> to vector<1x128xf32>
    %cst_109 = arith.constant 5.000000e-01 : f32
    %307 = vector.broadcast %cst_109 : f32 to vector<1x128xf32>
    %308 = arith.mulf %306, %307 : vector<1x128xf32>
    %cst_110 = arith.constant 5.000000e-01 : f32
    %309 = vector.broadcast %cst_110 : f32 to vector<1x128xf32>
    %310 = arith.addf %308, %309 : vector<1x128xf32>
    %311 = vector.extract_strided_slice %300 {offsets = [0, 256], sizes = [1, 128], strides = [1, 1]} : vector<1x512xf32> to vector<1x128xf32>
    %312 = vector.extract_strided_slice %300 {offsets = [0, 384], sizes = [1, 128], strides = [1, 1]} : vector<1x512xf32> to vector<1x128xf32>
    %cst_111 = arith.constant 5.000000e-01 : f32
    %313 = vector.broadcast %cst_111 : f32 to vector<1x128xf32>
    %314 = arith.mulf %312, %313 : vector<1x128xf32>
    %cst_112 = arith.constant 5.000000e-01 : f32
    %315 = vector.broadcast %cst_112 : f32 to vector<1x128xf32>
    %316 = arith.addf %314, %315 : vector<1x128xf32>
    %317 = arith.mulf %310, %294 : vector<1x128xf32>
    %318 = arith.mulf %305, %311 : vector<1x128xf32>
    %319 = arith.addf %317, %318 : vector<1x128xf32>
    %320 = math.tanh %319 : vector<1x128xf32>
    %321 = arith.mulf %316, %320 : vector<1x128xf32>
    %c96_i32_113 = arith.constant 96 : i32
    %322 = vector.broadcast %c96_i32_113 : i32 to vector<1x128xi32>
    %323 = arith.cmpi sge, %20, %322 : vector<1x128xi32>
    %324 = arith.select %323, %321, %295 : vector<1x128xi1>, vector<1x128xf32>
    %c7 = arith.constant 7 : index
    %c0_114 = arith.constant 0 : index
    %325 = vector.load %arg7[%c7, %c0_114] : memref<8x128xf32, #tpu.memory_space<vmem>>, vector<1x128xf32>
    tpu.vector_store %arg7[%c7, %c0_114], %324 {strides = array<i32>} : memref<8x128xf32, #tpu.memory_space<vmem>>, vector<1x128xf32>,
    %c0_115 = arith.constant 0 : index
    %c0_116 = arith.constant 0 : index
    %326 = vector.load %arg7[%c0_115, %c0_116] : memref<8x128xf32, #tpu.memory_space<vmem>>, vector<8x128xf32>
    %c0_117 = arith.constant 0 : index
    %c0_118 = arith.constant 0 : index
    %327 = vector.load %arg4[%c0_117, %c0_118] : memref<128x1xf32, #tpu.memory_space<vmem>>, vector<128x1xf32>
    %cst_119 = arith.constant dense<0.000000e+00> : vector<8x1xf32>
    %328 = tpu.matmul %326, %327, %cst_119 {dimension_numbers = #tpu.dot_dimension_numbers<[1], [0], [0], [1], [0, 0, 1, 1], [], []>} : vector<8x128xf32>, vector<128x1xf32>, vector<8x1xf32> -> vector<8x1xf32>
    %c0_120 = arith.constant 0 : index
    %c0_121 = arith.constant 0 : index
    %329 = vector.load %arg5[%c0_120, %c0_121] : memref<1x1xf32, #tpu.memory_space<vmem>>, vector<1x1xf32>
    %330 = vector.broadcast %329 : vector<1x1xf32> to vector<8x1xf32>
    %331 = arith.addf %328, %330 : vector<8x1xf32>
    %c0_122 = arith.constant 0 : index
    %c0_123 = arith.constant 0 : index
    %332 = vector.load %arg6[%c0_122, %c0_123] : memref<8x1xf32, #tpu.memory_space<vmem>>, vector<8x1xf32>
    tpu.vector_store %arg6[%c0_122, %c0_123], %331 {strides = array<i32>} : memref<8x1xf32, #tpu.memory_space<vmem>>, vector<8x1xf32>,
    return
  }
}

</mosaic_0001>

<bundles_post_ra>
// kernel: lstm_forward.1
= control target key start
LH: loop header
LB: loop body
LE: loop exit
PB: predicated region body
PF: predicated region fallthrough
CT: control target
= control target key end

     0   :  { %s3196_s0 = inlined_call_operand.vmem [shape: f32[8,16], index: 0, kind: input, shape index: {}]   ;;  %s3197_s1 = inlined_call_operand.vmem [shape: f32[16,512], index: 1, kind: input, shape index: {}]   ;;  %s3198_s2 = inlined_call_operand.hbm [shape: f32[128,512], index: 2, kind: input, shape index: {}]   ;;  %s3199_s3 = inlined_call_operand.vmem [shape: f32[1,512], index: 3, kind: input, shape index: {}]   ;;  %s3200_s4 = inlined_call_operand.vmem [shape: f32[128,1], index: 4, kind: input, shape index: {}]   ;;  %s3201_s5 = inlined_call_operand.<no memory space> [shape: f32[1,1], index: 5, kind: input, shape index: {}]   ;;  %s3202_s6 = inlined_call_operand.vmem [shape: f32[8,1], index: 6, kind: output, shape index: {}]  }
   0x1   :  { %v11_v0 = vstv %s3201_s5 }
   0x2   :  { %12 = vst [vmem:[#allocation3] sm:$0x1] %v11_v0 }
   0x3   :  { %13 = vsyncpa [#allocation5], 0  ;;  %s22_s25 = sshll.u32 %s3198_s2, 4  ;;  %s1908_s26 = smov [#allocation4]   ;;  %s23_s25 = int_to_ptr.hbm [resolvable:$true] %s22_s25 }
   0x4   :  { %s24_s27 = sshll.u32 %s1908_s26, 4  ;;  %s1909_s28 = smov 512   ;;  %s25_s27 = int_to_ptr.vmem [resolvable:$true] %s24_s27 }
   0x5   :  { %s1910_s29 = smov 32  }
   0x6   :  { %30 = dma.hbm_to_vmem [thread:$0]  %s23_s25, 8192, %s25_s27, [#allocation5], %s1909_s28, %s1909_s28, %s1910_s29  }
   0x7   :  { %1906 = dma.done.wait [#allocation5], 8192  }
   0x8   :  { %1907 = vsyncadd [#allocation5], 4294959104  ;;  %v46_v1 = vld [vmem:[%s3197_s1 + $0x20] sm:$0xff]  ;;  %v48_v2 = vld [vmem:[%s3197_s1 + $0x30] sm:$0xff]  ;;  %vm50_vm0 = vcmask 130048   ;;  %vm1753_vm7 = vcmask 7168  }
   0x9   :  { %v42_v3 = vld [vmem:[%s3197_s1] sm:$0xff]  ;;  %68 = vmatpush.msra.mxu1 %v46_v1  ;;  %108 = vmatpush.msra.mxu2 %v48_v2  ;;  %v44_v4 = vld [vmem:[%s3197_s1 + $0x10] sm:$0xff]  ;;  %v47_v6 = vld [vmem:[%s3197_s1 + $0x28] sm:$0xff] }
   0xa   :  { %v41_v5 = vld [vmem:[%s3196_s0] sm:$0xff]  ;;  %v49_v7 = vld [vmem:[%s3197_s1 + $0x38] sm:$0xff]  ;;  %v43_v8 = vld [vmem:[%s3197_s1 + $0x8] sm:$0xff] }
   0xb   :  { %69 = vmatpush.msra.mxu1 %v42_v3  ;;  %109 = vmatpush.msra.mxu2 %v44_v4  ;;  %v45_v9 = vld [vmem:[%s3197_s1 + $0x18] sm:$0xff]  ;;  %v1979_v10 = vld [vmem:[#allocation4 + $0x1e0] sm:$0xff]  ;;  %v1987_v13 = vld [vmem:[#allocation4 + $0x1f8] sm:$0xff] }
   0xc   :  { %1760 = vmatmul.msk.f32.vlgmr.msra.gmra.mxu1 %vm50_vm0, %v41_v5  ;;  %1762 = vmatmul.msk.f32.vlgmr.msra.gmra.mxu2 %vm50_vm0, %v41_v5  ;;  %v1981_v11 = vld [vmem:[#allocation4 + $0x1e8] sm:$0xff]  ;;  %v1983_v12 = vld [vmem:[#allocation4 + $0x1f0] sm:$0xff]  ;;  %3322 = vst [vmem:[#allocation7_spill] sm:$0xff] %v1987_v13  ;;  %v1991_v14 = vld [vmem:[#allocation4 + $0x1c0] sm:$0xff] }
   0xd   :  { %88 = vmatpush.msrb.mxu1 %v47_v6  ;;  %128 = vmatpush.msra.mxu3 %v49_v7  ;;  %3323 = vst [vmem:[#allocation8_spill] sm:$0xff] %v1991_v14  ;;  %v1993_v15 = vld [vmem:[#allocation4 + $0x1c8] sm:$0xff]  ;;  %v1995_v16 = vld [vmem:[#allocation4 + $0x1d0] sm:$0xff]  ;;  %v1999_v17 = vld [vmem:[#allocation4 + $0x1d8] sm:$0xff] }
   0xe   :  { %244 = vmatpush.msra.mxu0 %v1979_v10  ;;  %284 = vmatpush.msrb.mxu2 %v1983_v12  ;;  %v2003_v18 = vld [vmem:[#allocation4 + $0x1a0] sm:$0xff]  ;;  %v2005_v19 = vld [vmem:[#allocation4 + $0x1a8] sm:$0xff]  ;;  %v2007_v20 = vld [vmem:[#allocation4 + $0x1b0] sm:$0xff] }
   0xf   :  { %89 = vmatpush.msrb.mxu1 %v43_v8  ;;  %129 = vmatpush.msra.mxu3 %v45_v9  ;;  %v2011_v21 = vld [vmem:[#allocation4 + $0x1b8] sm:$0xff]  ;;  %v2015_v22 = vld [vmem:[#allocation4 + $0x180] sm:$0xff]  ;;  %v2017_v23 = vld [vmem:[#allocation4 + $0x188] sm:$0xff] }
  0x10   :  { %1763 = vmatmul.msk.f32.vlgmr.msra.gmra.mxu3 %vm50_vm0, %v41_v5  ;;  %245 = vmatpush.msra.mxu0 %v1991_v14  ;;  %v2019_v24 = vld [vmem:[#allocation4 + $0x190] sm:$0xff]  ;;  %v2023_v25 = vld [vmem:[#allocation4 + $0x198] sm:$0xff]  ;;  %v2025_v26 = vld [vmem:[#allocation4 + $0x160] sm:$0xff] }
  0x11   :  { %264 = vmatpush.msra.mxu1 %v1981_v11  ;;  %304 = vmatpush.msrb.mxu3 %v1987_v13  ;;  %v2027_v27 = vld [vmem:[#allocation4 + $0x168] sm:$0xff]  ;;  %v2031_v28 = vld [vmem:[#allocation4 + $0x170] sm:$0xff]  ;;  %v2033_v29 = vld [vmem:[#allocation4 + $0x178] sm:$0xff] }
  0x12   :  { %285 = vmatpush.msrb.mxu2 %v1995_v16  ;;  %246 = vmatpush.msra.mxu0 %v2003_v18  ;;  %v2035_v30 = vld [vmem:[#allocation4 + $0x140] sm:$0xff]  ;;  %v2039_v31 = vld [vmem:[#allocation4 + $0x148] sm:$0xff]  ;;  %v2041_v32 = vld [vmem:[#allocation4 + $0x150] sm:$0xff] }
  0x13   :  { %265 = vmatpush.msra.mxu1 %v1993_v15  ;;  %305 = vmatpush.msrb.mxu3 %v1999_v17  ;;  %v2043_v33 = vld [vmem:[#allocation4 + $0x158] sm:$0xff]  ;;  %v2047_v34 = vld [vmem:[#allocation4 + $0x120] sm:$0xff]  ;;  %v2049_v35 = vld [vmem:[#allocation4 + $0x128] sm:$0xff] }
  0x14   :  { %1761 = vmatmul.msk.f32.vlgmr.msrb.gmra.mxu1 %vm50_vm0, %v41_v5  ;;  %286 = vmatpush.msrb.mxu2 %v2007_v20  ;;  %v2053_v36 = vld [vmem:[#allocation4 + $0x130] sm:$0xff]  ;;  %v2055_v37 = vld [vmem:[#allocation4 + $0x138] sm:$0xff]  ;;  %v2059_v38 = vld [vmem:[#allocation4 + $0x100] sm:$0xff] }
  0x15   :  { %266 = vmatpush.msra.mxu1 %v2005_v19  ;;  %306 = vmatpush.msrb.mxu3 %v2011_v21  ;;  %v2061_v39 = vld [vmem:[#allocation4 + $0x108] sm:$0xff]  ;;  %v2065_v40 = vld [vmem:[#allocation4 + $0x110] sm:$0xff]  ;;  %v2067_v41 = vld [vmem:[#allocation4 + $0x118] sm:$0xff] }
  0x16   :  { %247 = vmatpush.msra.mxu0 %v2015_v22  ;;  %287 = vmatpush.msrb.mxu2 %v2019_v24  ;;  %3324 = vst [vmem:[#allocation9_spill] sm:$0xff] %v2061_v39  ;;  %v2071_v42 = vld [vmem:[#allocation4 + $0xe0] sm:$0xff]  ;;  %v2073_v43 = vld [vmem:[#allocation4 + $0xe8] sm:$0xff]  ;;  %v2077_v44 = vld [vmem:[#allocation4 + $0xf0] sm:$0xff] }
  0x17   :  { %267 = vmatpush.msra.mxu1 %v2017_v23  ;;  %307 = vmatpush.msrb.mxu3 %v2023_v25  ;;  %v2079_v45 = vld [vmem:[#allocation4 + $0xf8] sm:$0xff]  ;;  %v2083_v46 = vld [vmem:[#allocation4 + $0xc0] sm:$0xff]  ;;  %v2085_v47 = vld [vmem:[#allocation4 + $0xc8] sm:$0xff] }
  0x18   :  { %248 = vmatpush.msra.mxu0 %v2025_v26  ;;  %288 = vmatpush.msrb.mxu2 %v2031_v28  ;;  %v2089_v48 = vld [vmem:[#allocation4 + $0xd0] sm:$0xff]  ;;  %v2091_v49 = vld [vmem:[#allocation4 + $0xd8] sm:$0xff]  ;;  %v2095_v50 = vld [vmem:[#allocation4 + $0xa0] sm:$0xff] }
  0x19   :  { %268 = vmatpush.msra.mxu1 %v2027_v27  ;;  %308 = vmatpush.msrb.mxu3 %v2033_v29  ;;  %3325 = vst [vmem:[#allocation10_spill] sm:$0xff] %v2089_v48  ;;  %v2097_v51 = vld [vmem:[#allocation4 + $0xa8] sm:$0xff]  ;;  %v2101_v52 = vld [vmem:[#allocation4 + $0xb0] sm:$0xff]  ;;  %v2103_v53 = vld [vmem:[#allocation4 + $0xb8] sm:$0xff] }
  0x1a   :  { %249 = vmatpush.msra.mxu0 %v2035_v30  ;;  %289 = vmatpush.msrb.mxu2 %v2041_v32  ;;  %3326 = vst [vmem:[#allocation11_spill] sm:$0xff] %v2103_v53  ;;  %v2107_v54 = vld [vmem:[#allocation4 + $0x80] sm:$0xff]  ;;  %v2109_v55 = vld [vmem:[#allocation4 + $0x88] sm:$0xff]  ;;  %v2113_v56 = vld [vmem:[#allocation4 + $0x90] sm:$0xff] }
  0x1b   :  { %269 = vmatpush.msra.mxu1 %v2039_v31  ;;  %309 = vmatpush.msrb.mxu3 %v2043_v33  ;;  %3327 = vst [vmem:[#allocation12_spill] sm:$0xff] %v2107_v54  ;;  %v2115_v57 = vld [vmem:[#allocation4 + $0x98] sm:$0xff]  ;;  %v2119_v58 = vld [vmem:[#allocation4 + $0x60] sm:$0xff]  ;;  %v2121_v59 = vld [vmem:[#allocation4 + $0x68] sm:$0xff] }
  0x1c   :  { %250 = vmatpush.msra.mxu0 %v2047_v34  ;;  %290 = vmatpush.msrb.mxu2 %v2053_v36  ;;  %3328 = vst [vmem:[#allocation13_spill] sm:$0xff] %v2109_v55  ;;  %v2125_v60 = vld [vmem:[#allocation4 + $0x70] sm:$0xff]  ;;  %v2127_v61 = vld [vmem:[#allocation4 + $0x78] sm:$0xff]  ;;  %v2131_v62 = vld [vmem:[#allocation4 + $0x40] sm:$0xff] }
  0x1d   :  { %270 = vmatpush.msra.mxu1 %v2049_v35  ;;  %310 = vmatpush.msrb.mxu3 %v2055_v37  ;;  %3329 = vst [vmem:[#allocation14_spill] sm:$0xff] %v2113_v56  ;;  %v2133_v63 = vld [vmem:[#allocation4 + $0x48] sm:$0xff]  ;;  %v134_v0 = vld [vmem:[%s3199_s3] sm:$0xf]  ;;  %v2146_v3 = vld [vmem:[#allocation4 + $0x20] sm:$0xff] }
  0x1e   :  { %251 = vmatpush.msra.mxu0 %v2059_v38  ;;  %291 = vmatpush.msrb.mxu2 %v2065_v40  ;;  %3330 = vst [vmem:[#allocation15_spill] sm:$0xff] %v2115_v57  ;;  %v2140_v1 = vld [vmem:[#allocation4 + $0x50] sm:$0xff]  ;;  %v2142_v2 = vld [vmem:[#allocation4 + $0x58] sm:$0xff]  ;;  %v2148_v4 = vld [vmem:[#allocation4 + $0x28] sm:$0xff]  ;;  %v2156_v7 = vperm.slane %v134_v0, 0 }
  0x1f   :  { %271 = vmatpush.msra.mxu1 %v2061_v39  ;;  %311 = vmatpush.msrb.mxu3 %v2067_v41  ;;  %3331 = vst [vmem:[#allocation16_spill] sm:$0xff] %v2119_v58  ;;  %v2152_v5 = vld [vmem:[#allocation4 + $0x30] sm:$0xff]  ;;  %v2154_v6 = vld [vmem:[#allocation4 + $0x38] sm:$0xff]  ;;  %v2160_v8 = vld [vmem:[#allocation4] sm:$0xff] }
  0x20   :  { %252 = vmatpush.msra.mxu0 %v2071_v42  ;;  %292 = vmatpush.msrb.mxu2 %v2077_v44  ;;  %3332 = vst [vmem:[#allocation17_spill] sm:$0xff] %v2121_v59  ;;  %v2162_v9 = vld [vmem:[#allocation4 + $0x8] sm:$0xff] }
  0x21   :  { %272 = vmatpush.msra.mxu1 %v2073_v43  ;;  %312 = vmatpush.msrb.mxu3 %v2079_v45  ;;  %3333 = vst [vmem:[#allocation18_spill] sm:$0xff] %v2125_v60 }
  0x22   :  { %253 = vmatpush.msra.mxu0 %v2083_v46  ;;  %293 = vmatpush.msrb.mxu2 %v2089_v48  ;;  %3334 = vst [vmem:[#allocation19_spill] sm:$0xff] %v2127_v61 }
  0x23   :  { %273 = vmatpush.msra.mxu1 %v2085_v47  ;;  %313 = vmatpush.msrb.mxu3 %v2091_v49  ;;  %3335 = vst [vmem:[#allocation20_spill] sm:$0xff] %v2131_v62 }
  0x24   :  { %254 = vmatpush.msra.mxu0 %v2095_v50  ;;  %294 = vmatpush.msrb.mxu2 %v2101_v52  ;;  %3336 = vst [vmem:[#allocation21_spill] sm:$0xff] %v2133_v63 }
  0x25   :  { %274 = vmatpush.msra.mxu1 %v2097_v51  ;;  %314 = vmatpush.msrb.mxu3 %v2103_v53  ;;  %3337 = vst [vmem:[#allocation22_spill] sm:$0xff] %v2140_v1 }
  0x26   :  { %255 = vmatpush.msra.mxu0 %v2107_v54  ;;  %295 = vmatpush.msrb.mxu2 %v2113_v56  ;;  %3338 = vst [vmem:[#allocation23_spill] sm:$0xff] %v2142_v2 }
  0x27   :  { %275 = vmatpush.msra.mxu1 %v2109_v55  ;;  %315 = vmatpush.msrb.mxu3 %v2115_v57  ;;  %3339 = vst [vmem:[#allocation24_spill] sm:$0xff] %v2146_v3 }
  0x28   :  { %256 = vmatpush.msra.mxu0 %v2119_v58  ;;  %296 = vmatpush.msrb.mxu2 %v2125_v60  ;;  %3340 = vst [vmem:[#allocation25_spill] sm:$0xff] %v2148_v4 }
  0x29   :  { %276 = vmatpush.msra.mxu1 %v2121_v59  ;;  %316 = vmatpush.msrb.mxu3 %v2127_v61  ;;  %3341 = vst [vmem:[#allocation26_spill] sm:$0xff] %v2152_v5 }
  0x2a   :  { %257 = vmatpush.msra.mxu0 %v2131_v62  ;;  %3342 = vst [vmem:[#allocation27_spill] sm:$0xff] %v2154_v6  ;;  %297 = vmatpush.msrb.mxu2 %v2140_v1  ;;  %v2168_v62 = vld [vmem:[#allocation4 + $0x18] sm:$0xff] }
  0x2b   :  { %277 = vmatpush.msra.mxu1 %v2133_v63  ;;  %3343 = vst [vmem:[#allocation28_spill] sm:$0xff] %v2156_v7  ;;  %317 = vmatpush.msrb.mxu3 %v2142_v2  ;;  %v2166_v63 = vld [vmem:[#allocation4 + $0x10] sm:$0xff] }
  0x2c   :  { %3344 = vst [vmem:[#allocation29_spill] sm:$0xff] %v2160_v8  ;;  %258 = vmatpush.msra.mxu0 %v2146_v3  ;;  %298 = vmatpush.msrb.mxu2 %v2152_v5  ;;  %v2183_v5 = vperm.slane %v134_v0, 1 }
  0x2d   :  { %3345 = vst [vmem:[#allocation30_spill] sm:$0xff] %v2162_v9  ;;  %278 = vmatpush.msra.mxu1 %v2148_v4  ;;  %318 = vmatpush.msrb.mxu3 %v2154_v6  ;;  %v2181_v4 = vperm.slane %v134_v0, 2 }
  0x2e   :  { %3346 = vst [vmem:[#allocation31_spill] sm:$0xff] %v2166_v63  ;;  %259 = vmatpush.msra.mxu0 %v2160_v8  ;;  %299 = vmatpush.msrb.mxu2 %v2166_v63 }
  0x2f   :  { %3347 = vst [vmem:[#allocation32_spill] sm:$0xff] %v2168_v62  ;;  %279 = vmatpush.msra.mxu1 %v2162_v9  ;;  %319 = vmatpush.msrb.mxu3 %v2168_v62 }
  0x30   :  { %350 = vmatpush.msrb.mxu0 %v1979_v10  ;;  %3349 = vst [vmem:[#allocation34_spill] sm:$0xff] %v2181_v4  ;;  %390 = vmatpush.msra.mxu2 %v1983_v12 }
  0x31   :  { %370 = vmatpush.msrb.mxu1 %v1981_v11  ;;  %3350 = vst [vmem:[#allocation35_spill] sm:$0xff] %v2183_v5  ;;  %410 = vmatpush.msra.mxu3 %v1987_v13 }
  0x32   :  { %351 = vmatpush.msrb.mxu0 %v1991_v14  ;;  %391 = vmatpush.msra.mxu2 %v1995_v16 }
  0x33   :  { %371 = vmatpush.msrb.mxu1 %v1993_v15  ;;  %411 = vmatpush.msra.mxu3 %v1999_v17 }
  0x34   :  { %352 = vmatpush.msrb.mxu0 %v2003_v18  ;;  %392 = vmatpush.msra.mxu2 %v2007_v20 }
  0x35   :  { %372 = vmatpush.msrb.mxu1 %v2005_v19  ;;  %412 = vmatpush.msra.mxu3 %v2011_v21 }
  0x36   :  { %353 = vmatpush.msrb.mxu0 %v2015_v22  ;;  %393 = vmatpush.msra.mxu2 %v2019_v24 }
  0x37   :  { %373 = vmatpush.msrb.mxu1 %v2017_v23  ;;  %413 = vmatpush.msra.mxu3 %v2023_v25 }
  0x38   :  { %354 = vmatpush.msrb.mxu0 %v2025_v26  ;;  %394 = vmatpush.msra.mxu2 %v2031_v28 }
  0x39   :  { %374 = vmatpush.msrb.mxu1 %v2027_v27  ;;  %414 = vmatpush.msra.mxu3 %v2033_v29 }
  0x3a   :  { %355 = vmatpush.msrb.mxu0 %v2035_v30  ;;  %395 = vmatpush.msra.mxu2 %v2041_v32 }
  0x3b   :  { %375 = vmatpush.msrb.mxu1 %v2039_v31  ;;  %415 = vmatpush.msra.mxu3 %v2043_v33 }
  0x3c   :  { %356 = vmatpush.msrb.mxu0 %v2047_v34  ;;  %396 = vmatpush.msra.mxu2 %v2053_v36 }
  0x3d   :  { %376 = vmatpush.msrb.mxu1 %v2049_v35  ;;  %416 = vmatpush.msra.mxu3 %v2055_v37 }
  0x3e   :  { %357 = vmatpush.msrb.mxu0 %v2059_v38  ;;  %397 = vmatpush.msra.mxu2 %v2065_v40 }
  0x3f   :  { %377 = vmatpush.msrb.mxu1 %v2061_v39  ;;  %417 = vmatpush.msra.mxu3 %v2067_v41 }
  0x40   :  { %358 = vmatpush.msrb.mxu0 %v2071_v42  ;;  %398 = vmatpush.msra.mxu2 %v2077_v44 }
  0x41   :  { %378 = vmatpush.msrb.mxu1 %v2073_v43  ;;  %418 = vmatpush.msra.mxu3 %v2079_v45 }
  0x42   :  { %359 = vmatpush.msrb.mxu0 %v2083_v46  ;;  %399 = vmatpush.msra.mxu2 %v2089_v48 }
  0x43   :  { %379 = vmatpush.msrb.mxu1 %v2085_v47  ;;  %419 = vmatpush.msra.mxu3 %v2091_v49 }
  0x44   :  { %360 = vmatpush.msrb.mxu0 %v2095_v50  ;;  %400 = vmatpush.msra.mxu2 %v2101_v52 }
  0x45   :  { %380 = vmatpush.msrb.mxu1 %v2097_v51  ;;  %420 = vmatpush.msra.mxu3 %v2103_v53 }
  0x46   :  { %361 = vmatpush.msrb.mxu0 %v2107_v54  ;;  %401 = vmatpush.msra.mxu2 %v2113_v56 }
  0x47   :  { %381 = vmatpush.msrb.mxu1 %v2109_v55  ;;  %421 = vmatpush.msra.mxu3 %v2115_v57 }
  0x48   :  { %362 = vmatpush.msrb.mxu0 %v2119_v58  ;;  %402 = vmatpush.msra.mxu2 %v2125_v60 }
  0x49   :  { %382 = vmatpush.msrb.mxu1 %v2121_v59  ;;  %v3362_v59 = vld [vmem:[#allocation26_spill] sm:$0xff] }
  0x4a   :  { %403 = vmatpush.msra.mxu2 %v2140_v1 }
  0x4c   :  { %404 = vmatpush.msra.mxu2 %v3362_v59 }
  0x4e   :  { %405 = vmatpush.msra.mxu2 %v2166_v63 }
  0x89   :  { %v71_v61 = vpop.f32.mrf.mxu1 }
  0x8a   :  { %v2175_v2 = vadd.f32 %v2156_v7, %v71_v61  ;;  %v2192_v7 = vperm.slane %v134_v0, 3 }
  0x8c   :  { %3348 = vst [vmem:[#allocation33_spill] sm:$0xff] %v2175_v2  ;;  %1772 = vtanh.f32 %v2175_v2 }
  0x8d   :  { %3351 = vst [vmem:[#allocation36_spill] sm:$0xff] %v2192_v7 }
  0x8f   :  { %v111_v9 = vpop.f32.mrf.mxu2 }
  0x90   :  { %v2197_v13 = vadd.f32 %v2181_v4, %v111_v9 }
  0x91   :  { %v91_v61 = vpop.f32.mrf.mxu1 }
  0x92   :  { %3352 = vst [vmem:[#allocation37_spill] sm:$0xff] %v2197_v13  ;;  %v2200_v14 = vadd.f32 %v2183_v5, %v91_v61  ;;  %v1773_v9 = vpop.eup %1772  ;;  %v148_v61 = vlaneseq }
  0x93   :  { %v131_v2 = vpop.f32.mrf.mxu3 }
  0x94   :  { %3353 = vst [vmem:[#allocation38_spill] sm:$0xff] %v2200_v14  ;;  %1774 = vtanh.f32 %v2200_v14  ;;  %v2210_v0 = vadd.f32 %v2192_v7, %v131_v2  ;;  %v154_v2 = vmul.f32 0.5, %v1773_v9 }
  0x95   :  { %1776 = vtanh.f32 %v2197_v13  ;;  %v2228_v13 = vand.u32 127, %v148_v61 }
  0x96   :  { %3354 = vst [vmem:[#allocation39_spill] sm:$0xff] %v2210_v0  ;;  %1778 = vtanh.f32 %v2210_v0  ;;  %v155_v9 = vadd.f32 0.5, %v154_v2  ;;  %v3359_v2 = vld [vmem:[#allocation21_spill] sm:$0xff] }
  0x97   :  { %3355 = vst [vmem:[#allocation40_spill] sm:$0xff] %v2228_v13  ;;  %vm165_vm1 = vcmp.lt.s32.totalorder %v2228_v13, 32  ;;  %383 = vmatpush.msrb.mxu1 %v3359_v2  ;;  %vm339_vm2 = vcmp.lt.s32.totalorder %v2228_v13, 64  ;;  %vm445_vm3 = vcmp.lt.s32.totalorder %v2228_v13, 96  ;;  %v2612_v13 = vld [vmem:[#allocation4 + $0x30] sm:$0xff] }
  0x9a   :  { %v1775_v7 = vpop.eup %1774 }
  0x9b   :  { %v156_v4 = vmul.f32 0.5, %v1775_v7  ;;  %v1777_v5 = vpop.eup %1776 }
  0x9c   :  { %v1779_v7 = vpop.eup %1778  ;;  %v161_v39 = vmul.f32 %v1777_v5, %v155_v9  ;;  %v3360_v9 = vld [vmem:[#allocation23_spill] sm:$0xff] }
  0x9d   :  { %v157_v0 = vadd.f32 0.5, %v156_v4  ;;  %v158_v61 = vmul.f32 0.5, %v1779_v7 }
  0x9f   :  { %v160_v14 = vmul.f32 0.0, %v157_v0  ;;  %v3358_v0 = vld [vmem:[#allocation20_spill] sm:$0xff] }
  0xa0   :  { %363 = vmatpush.msrb.mxu0 %v3358_v0 }
  0xa1   :  { %v162_v4 = vadd.f32 %v161_v39, %v160_v14  ;;  %v159_v14 = vadd.f32 0.5, %v158_v61  ;;  %v3357_v39 = vld [vmem:[#allocation19_spill] sm:$0xff]  ;;  %v3363_v61 = vld [vmem:[#allocation30_spill] sm:$0xff] }
  0xa2   :  { %422 = vmatpush.msra.mxu3 %v3357_v39  ;;  %364 = vmatpush.msrb.mxu0 %v2146_v3 }
  0xa3   :  { %1780 = vtanh.f32 %v162_v4  ;;  %v2247_v5 = vsel %vm165_vm1, %v162_v4, 0.0  ;;  %v3361_v4 = vld [vmem:[#allocation25_spill] sm:$0xff] }
  0xa4   :  { %3356 = vst [vmem:[#allocation41_spill] sm:$0xff] %v2247_v5  ;;  %423 = vmatpush.msra.mxu3 %v3360_v9  ;;  %384 = vmatpush.msrb.mxu1 %v3361_v4 }
  0xa5   :  { %365 = vmatpush.msrb.mxu0 %v2160_v8 }
  0xa6   :  { %424 = vmatpush.msra.mxu3 %v2154_v6  ;;  %385 = vmatpush.msrb.mxu1 %v3363_v61 }
  0xa8   :  { %425 = vmatpush.msra.mxu3 %v2168_v62 }
  0xa9   :  { %v1781_v7 = vpop.eup %1780 }
  0xaa   :  { %v164_v5 = vmul.f32 %v1781_v7, %v159_v14  ;;  %v3364_v14 = vld [vmem:[#allocation7_spill] sm:$0xff]  ;;  %v3365_v7 = vld [vmem:[#allocation8_spill] sm:$0xff] }
  0xac   :  { %1764 = vmatmul.msk.f32.vlgmr.msra.gmra.mxu0 %vm165_vm1, %v164_v5  ;;  %1765 = vmatmul.msk.f32.vlgmr.msra.gmra.mxu1 %vm165_vm1, %v164_v5  ;;  %v2273_v3 = vsel %vm165_vm1, %v164_v5, 0.0 }
  0xad   :  { %1766 = vmatmul.msk.f32.vlgmr.msrb.gmra.mxu2 %vm165_vm1, %v164_v5  ;;  %1767 = vmatmul.msk.f32.vlgmr.msrb.gmra.mxu3 %vm165_vm1, %v164_v5  ;;  %v3366_v5 = vld [vmem:[#allocation9_spill] sm:$0xff] }
  0xae   :  { %456 = vmatpush.msra.mxu0 %v1979_v10  ;;  %476 = vmatpush.msra.mxu1 %v1981_v11 }
  0xaf   :  { %496 = vmatpush.msrb.mxu2 %v1983_v12  ;;  %516 = vmatpush.msrb.mxu3 %v3364_v14 }
  0xb0   :  { %457 = vmatpush.msra.mxu0 %v3365_v7  ;;  %477 = vmatpush.msra.mxu1 %v1993_v15 }
  0xb1   :  { %497 = vmatpush.msrb.mxu2 %v1995_v16  ;;  %517 = vmatpush.msrb.mxu3 %v1999_v17 }
  0xb2   :  { %458 = vmatpush.msra.mxu0 %v2003_v18  ;;  %478 = vmatpush.msra.mxu1 %v2005_v19 }
  0xb3   :  { %498 = vmatpush.msrb.mxu2 %v2007_v20  ;;  %518 = vmatpush.msrb.mxu3 %v2011_v21 }
  0xb4   :  { %459 = vmatpush.msra.mxu0 %v2015_v22  ;;  %479 = vmatpush.msra.mxu1 %v2017_v23 }
  0xb5   :  { %499 = vmatpush.msrb.mxu2 %v2019_v24  ;;  %519 = vmatpush.msrb.mxu3 %v2023_v25 }
  0xb6   :  { %460 = vmatpush.msra.mxu0 %v2025_v26  ;;  %480 = vmatpush.msra.mxu1 %v2027_v27 }
  0xb7   :  { %500 = vmatpush.msrb.mxu2 %v2031_v28  ;;  %520 = vmatpush.msrb.mxu3 %v2033_v29 }
  0xb8   :  { %461 = vmatpush.msra.mxu0 %v2035_v30  ;;  %481 = vmatpush.msra.mxu1 %v2039_v31 }
  0xb9   :  { %501 = vmatpush.msrb.mxu2 %v2041_v32  ;;  %521 = vmatpush.msrb.mxu3 %v2043_v33 }
  0xba   :  { %462 = vmatpush.msra.mxu0 %v2047_v34  ;;  %482 = vmatpush.msra.mxu1 %v2049_v35 }
  0xbb   :  { %502 = vmatpush.msrb.mxu2 %v2053_v36  ;;  %522 = vmatpush.msrb.mxu3 %v2055_v37 }
  0xbc   :  { %463 = vmatpush.msra.mxu0 %v2059_v38  ;;  %483 = vmatpush.msra.mxu1 %v3366_v5 }
  0xbd   :  { %503 = vmatpush.msrb.mxu2 %v2065_v40  ;;  %523 = vmatpush.msrb.mxu3 %v2067_v41 }
  0xbe   :  { %464 = vmatpush.msra.mxu0 %v2071_v42  ;;  %484 = vmatpush.msra.mxu1 %v2073_v43 }
  0xbf   :  { %504 = vmatpush.msrb.mxu2 %v2077_v44  ;;  %524 = vmatpush.msrb.mxu3 %v2079_v45 }
  0xc0   :  { %465 = vmatpush.msra.mxu0 %v2083_v46  ;;  %485 = vmatpush.msra.mxu1 %v2085_v47 }
  0xc1   :  { %505 = vmatpush.msrb.mxu2 %v2089_v48  ;;  %525 = vmatpush.msrb.mxu3 %v2091_v49  ;;  %v3367_v48 = vld [vmem:[#allocation17_spill] sm:$0xff] }
  0xc2   :  { %466 = vmatpush.msra.mxu0 %v2095_v50  ;;  %486 = vmatpush.msra.mxu1 %v2097_v51 }
  0xc3   :  { %506 = vmatpush.msrb.mxu2 %v2101_v52  ;;  %526 = vmatpush.msrb.mxu3 %v2103_v53 }
  0xc4   :  { %467 = vmatpush.msra.mxu0 %v2107_v54  ;;  %487 = vmatpush.msra.mxu1 %v2109_v55  ;;  %v3368_v55 = vld [vmem:[#allocation24_spill] sm:$0xff] }
  0xc5   :  { %507 = vmatpush.msrb.mxu2 %v2113_v56  ;;  %527 = vmatpush.msrb.mxu3 %v2115_v57 }
  0xc6   :  { %468 = vmatpush.msra.mxu0 %v2119_v58  ;;  %488 = vmatpush.msra.mxu1 %v3367_v48 }
  0xc7   :  { %508 = vmatpush.msrb.mxu2 %v2125_v60  ;;  %528 = vmatpush.msrb.mxu3 %v3357_v39 }
  0xc8   :  { %469 = vmatpush.msra.mxu0 %v3358_v0  ;;  %489 = vmatpush.msra.mxu1 %v3359_v2  ;;  %v3369_v2 = vld [vmem:[#allocation33_spill] sm:$0xff]  ;;  %v3370_v0 = vld [vmem:[#allocation38_spill] sm:$0xff] }
  0xc9   :  { %509 = vmatpush.msrb.mxu2 %v2140_v1  ;;  %529 = vmatpush.msrb.mxu3 %v3360_v9  ;;  %v236_v1 = vrot.slane %v3369_v2, 1  ;;  %v237_v9 = vrot.slane %v3370_v0, 1 }
  0xca   :  { %470 = vmatpush.msra.mxu0 %v3368_v55  ;;  %490 = vmatpush.msra.mxu1 %v3361_v4 }
  0xcb   :  { %510 = vmatpush.msrb.mxu2 %v3362_v59  ;;  %530 = vmatpush.msrb.mxu3 %v2154_v6  ;;  %v3371_v59 = vld [vmem:[#allocation37_spill] sm:$0xff] }
  0xcc   :  { %471 = vmatpush.msra.mxu0 %v2160_v8  ;;  %491 = vmatpush.msra.mxu1 %v3363_v61  ;;  %v238_v6 = vrot.slane %v3371_v59, 1  ;;  %v3372_v8 = vld [vmem:[#allocation39_spill] sm:$0xff] }
  0xcd   :  { %511 = vmatpush.msrb.mxu2 %v2166_v63  ;;  %531 = vmatpush.msrb.mxu3 %v2168_v62  ;;  %v239_v58 = vrot.slane %v3372_v8, 1 }
 0x129   :  { %v261_v39 = vpop.f32.mrf.mxu0  ;;  %v281_v55 = vpop.f32.mrf.mxu1 }
 0x12a   :  { %v262_v60 = vadd.f32 %v261_v39, %v236_v1  ;;  %v282_v4 = vadd.f32 %v281_v55, %v237_v9  ;;  %v3373_v1 = vld [vmem:[#allocation41_spill] sm:$0xff] }
 0x12c   :  { %1782 = vtanh.f32 %v262_v60 }
 0x12d   :  { %1784 = vtanh.f32 %v282_v4 }
 0x130   :  { %v301_v48 = vpop.f32.mrf.mxu2  ;;  %v321_v61 = vpop.f32.mrf.mxu3 }
 0x131   :  { %v302_v57 = vadd.f32 %v301_v48, %v238_v6  ;;  %v322_v56 = vadd.f32 %v321_v61, %v239_v58 }
 0x132   :  { %v1783_v63 = vpop.eup %1782 }
 0x133   :  { %v1785_v62 = vpop.eup %1784  ;;  %1786 = vtanh.f32 %v302_v57  ;;  %v328_v2 = vmul.f32 0.5, %v1783_v63 }
 0x134   :  { %v330_v54 = vmul.f32 0.5, %v1785_v62  ;;  %1788 = vtanh.f32 %v322_v56 }
 0x135   :  { %v329_v53 = vadd.f32 0.5, %v328_v2 }
 0x136   :  { %v331_v0 = vadd.f32 0.5, %v330_v54 }
 0x138   :  { %v334_v55 = vmul.f32 %v331_v0, %v3373_v1 }
 0x139   :  { %v1787_v60 = vpop.eup %1786 }
 0x13a   :  { %v335_v39 = vmul.f32 %v1787_v60, %v329_v53  ;;  %v1789_v9 = vpop.eup %1788 }
 0x13b   :  { %v332_v58 = vmul.f32 0.5, %v1789_v9 }
 0x13c   :  { %v336_v4 = vadd.f32 %v335_v39, %v334_v55 }
 0x13d   :  { %v333_v6 = vadd.f32 0.5, %v332_v58  ;;  %v2435_v58 = vld [vmem:[#allocation4 + $0x1e0] sm:$0xff] }
 0x13e   :  { %1790 = vtanh.f32 %v336_v4  ;;  %v2352_v48 = vsel %vm339_vm2, %v336_v4, %v3373_v1 }
 0x144   :  { %v1791_v57 = vpop.eup %1790 }
 0x145   :  { %v338_v63 = vmul.f32 %v1791_v57, %v333_v6  ;;  %v2437_v6 = vld [vmem:[#allocation4 + $0x1e8] sm:$0xff]  ;;  %v2439_v57 = vld [vmem:[#allocation4 + $0x1f0] sm:$0xff] }
 0x147   :  { %v2355_v54 = vsel %vm339_vm2, %v338_v63, %v2273_v3 }
 0x148   :  { %366 = vmatmul.f32.vlgmr.msrb.gmra.mxu0 %v2355_v54  ;;  %386 = vmatmul.f32.vlgmr.msrb.gmra.mxu1 %v2355_v54 }
 0x149   :  { %406 = vmatmul.f32.vlgmr.msra.gmra.mxu2 %v2355_v54  ;;  %426 = vmatmul.f32.vlgmr.msra.gmra.mxu3 %v2355_v54 }
 0x14a   :  { %624 = vmatpush.msrb.mxu0 %v1979_v10  ;;  %644 = vmatpush.msrb.mxu1 %v1981_v11  ;;  %v3374_v10 = vld [vmem:[#allocation10_spill] sm:$0xff]  ;;  %v3375_v11 = vld [vmem:[#allocation11_spill] sm:$0xff] }
 0x14b   :  { %664 = vmatpush.msra.mxu2 %v1983_v12  ;;  %684 = vmatpush.msra.mxu3 %v3364_v14  ;;  %v3376_v12 = vld [vmem:[#allocation12_spill] sm:$0xff] }
 0x14c   :  { %625 = vmatpush.msrb.mxu0 %v3365_v7  ;;  %645 = vmatpush.msrb.mxu1 %v1993_v15  ;;  %v3377_v15 = vld [vmem:[#allocation13_spill] sm:$0xff] }
 0x14d   :  { %665 = vmatpush.msra.mxu2 %v1995_v16  ;;  %685 = vmatpush.msra.mxu3 %v1999_v17  ;;  %v3378_v16 = vld [vmem:[#allocation14_spill] sm:$0xff]  ;;  %v3379_v17 = vld [vmem:[#allocation15_spill] sm:$0xff] }
 0x14e   :  { %626 = vmatpush.msrb.mxu0 %v2003_v18  ;;  %646 = vmatpush.msrb.mxu1 %v2005_v19  ;;  %v3380_v18 = vld [vmem:[#allocation16_spill] sm:$0xff]  ;;  %v3381_v19 = vld [vmem:[#allocation17_spill] sm:$0xff] }
 0x14f   :  { %666 = vmatpush.msra.mxu2 %v2007_v20  ;;  %686 = vmatpush.msra.mxu3 %v2011_v21  ;;  %v3382_v20 = vld [vmem:[#allocation18_spill] sm:$0xff]  ;;  %v3383_v21 = vld [vmem:[#allocation19_spill] sm:$0xff] }
 0x150   :  { %627 = vmatpush.msrb.mxu0 %v2015_v22  ;;  %647 = vmatpush.msrb.mxu1 %v2017_v23  ;;  %v3384_v22 = vld [vmem:[#allocation20_spill] sm:$0xff]  ;;  %v3385_v23 = vld [vmem:[#allocation21_spill] sm:$0xff] }
 0x151   :  { %667 = vmatpush.msra.mxu2 %v2019_v24  ;;  %687 = vmatpush.msra.mxu3 %v2023_v25  ;;  %v3386_v24 = vld [vmem:[#allocation22_spill] sm:$0xff]  ;;  %v3387_v25 = vld [vmem:[#allocation23_spill] sm:$0xff]  ;;  %3412 = vst [vmem:[#allocation20_spill] sm:$0xff] %v2612_v13 }
 0x152   :  { %628 = vmatpush.msrb.mxu0 %v2025_v26  ;;  %648 = vmatpush.msrb.mxu1 %v2027_v27  ;;  %v3388_v26 = vld [vmem:[#allocation24_spill] sm:$0xff]  ;;  %v3389_v27 = vld [vmem:[#allocation25_spill] sm:$0xff] }
 0x153   :  { %668 = vmatpush.msra.mxu2 %v2031_v28  ;;  %688 = vmatpush.msra.mxu3 %v2033_v29  ;;  %v3390_v28 = vld [vmem:[#allocation26_spill] sm:$0xff]  ;;  %v3391_v29 = vld [vmem:[#allocation27_spill] sm:$0xff] }
 0x154   :  { %629 = vmatpush.msrb.mxu0 %v2035_v30  ;;  %649 = vmatpush.msrb.mxu1 %v2039_v31  ;;  %v3392_v30 = vld [vmem:[#allocation29_spill] sm:$0xff]  ;;  %v3393_v31 = vld [vmem:[#allocation30_spill] sm:$0xff] }
 0x155   :  { %669 = vmatpush.msra.mxu2 %v2041_v32  ;;  %689 = vmatpush.msra.mxu3 %v2043_v33  ;;  %v3394_v32 = vld [vmem:[#allocation31_spill] sm:$0xff]  ;;  %v3395_v33 = vld [vmem:[#allocation32_spill] sm:$0xff] }
 0x156   :  { %630 = vmatpush.msrb.mxu0 %v2047_v34  ;;  %650 = vmatpush.msrb.mxu1 %v2049_v35  ;;  %v3396_v34 = vld [vmem:[#allocation33_spill] sm:$0xff] }
 0x157   :  { %670 = vmatpush.msra.mxu2 %v2053_v36  ;;  %690 = vmatpush.msra.mxu3 %v2055_v37  ;;  %v342_v35 = vrot.slane %v3396_v34, 2  ;;  %v3397_v36 = vld [vmem:[#allocation38_spill] sm:$0xff]  ;;  %v448_v9 = vrot.slane %v3396_v34, 3 }
 0x158   :  { %631 = vmatpush.msrb.mxu0 %v2059_v38  ;;  %651 = vmatpush.msrb.mxu1 %v3366_v5  ;;  %v343_v37 = vrot.slane %v3397_v36, 2  ;;  %v449_v4 = vrot.slane %v3397_v36, 3 }
 0x159   :  { %671 = vmatpush.msra.mxu2 %v2065_v40  ;;  %691 = vmatpush.msra.mxu3 %v2067_v41 }
 0x15a   :  { %632 = vmatpush.msrb.mxu0 %v2071_v42  ;;  %652 = vmatpush.msrb.mxu1 %v2073_v43  ;;  %v344_v43 = vrot.slane %v3371_v59, 2 }
 0x15b   :  { %672 = vmatpush.msra.mxu2 %v2077_v44  ;;  %692 = vmatpush.msra.mxu3 %v2079_v45  ;;  %v345_v45 = vrot.slane %v3372_v8, 2 }
 0x15c   :  { %633 = vmatpush.msrb.mxu0 %v2083_v46  ;;  %653 = vmatpush.msrb.mxu1 %v2085_v47 }
 0x15d   :  { %673 = vmatpush.msra.mxu2 %v3374_v10  ;;  %693 = vmatpush.msra.mxu3 %v2091_v49 }
 0x15e   :  { %634 = vmatpush.msrb.mxu0 %v2095_v50  ;;  %654 = vmatpush.msrb.mxu1 %v2097_v51 }
 0x15f   :  { %674 = vmatpush.msra.mxu2 %v2101_v52  ;;  %694 = vmatpush.msra.mxu3 %v3375_v11 }
 0x160   :  { %635 = vmatpush.msrb.mxu0 %v3376_v12  ;;  %655 = vmatpush.msrb.mxu1 %v3377_v15  ;;  %v450_v12 = vrot.slane %v3371_v59, 3 }
 0x161   :  { %675 = vmatpush.msra.mxu2 %v3378_v16  ;;  %695 = vmatpush.msra.mxu3 %v3379_v17  ;;  %v451_v16 = vrot.slane %v3372_v8, 3 }
 0x162   :  { %636 = vmatpush.msrb.mxu0 %v3380_v18  ;;  %656 = vmatpush.msrb.mxu1 %v3381_v19 }
 0x163   :  { %676 = vmatpush.msra.mxu2 %v3382_v20  ;;  %696 = vmatpush.msra.mxu3 %v3383_v21 }
 0x164   :  { %637 = vmatpush.msrb.mxu0 %v3384_v22  ;;  %657 = vmatpush.msrb.mxu1 %v3385_v23 }
 0x165   :  { %677 = vmatpush.msra.mxu2 %v3386_v24  ;;  %697 = vmatpush.msra.mxu3 %v3387_v25 }
 0x166   :  { %638 = vmatpush.msrb.mxu0 %v3388_v26  ;;  %658 = vmatpush.msrb.mxu1 %v3389_v27 }
 0x167   :  { %678 = vmatpush.msra.mxu2 %v3390_v28  ;;  %698 = vmatpush.msra.mxu3 %v3391_v29 }
 0x168   :  { %639 = vmatpush.msrb.mxu0 %v3392_v30  ;;  %659 = vmatpush.msrb.mxu1 %v3393_v31 }
 0x169   :  { %679 = vmatpush.msra.mxu2 %v3394_v32  ;;  %699 = vmatpush.msra.mxu3 %v3395_v33 }
 0x1c5   :  { %v367_v38 = vpop.f32.mrf.mxu0  ;;  %v387_v40 = vpop.f32.mrf.mxu1 }
 0x1c6   :  { %v368_v41 = vadd.f32 %v367_v38, %v342_v35  ;;  %v388_v42 = vadd.f32 %v387_v40, %v343_v37  ;;  %v2452_v37 = vld [vmem:[#allocation4 + $0x1c0] sm:$0xff]  ;;  %v2454_v38 = vld [vmem:[#allocation4 + $0x1c8] sm:$0xff]  ;;  %v2456_v40 = vld [vmem:[#allocation4 + $0x1d0] sm:$0xff] }
 0x1c8   :  { %1792 = vtanh.f32 %v368_v41  ;;  %v2460_v41 = vld [vmem:[#allocation4 + $0x1d8] sm:$0xff] }
 0x1c9   :  { %1794 = vtanh.f32 %v388_v42  ;;  %v2464_v42 = vld [vmem:[#allocation4 + $0x1a0] sm:$0xff] }
 0x1cc   :  { %v407_v44 = vpop.f32.mrf.mxu2  ;;  %v427_v46 = vpop.f32.mrf.mxu3 }
 0x1cd   :  { %v408_v47 = vadd.f32 %v407_v44, %v344_v43  ;;  %v428_v50 = vadd.f32 %v427_v46, %v345_v45  ;;  %v2466_v43 = vld [vmem:[#allocation4 + $0x1a8] sm:$0xff]  ;;  %v2468_v44 = vld [vmem:[#allocation4 + $0x1b0] sm:$0xff]  ;;  %v2472_v45 = vld [vmem:[#allocation4 + $0x1b8] sm:$0xff] }
 0x1ce   :  { %v1793_v49 = vpop.eup %1792  ;;  %v2476_v46 = vld [vmem:[#allocation4 + $0x180] sm:$0xff] }
 0x1cf   :  { %v1795_v51 = vpop.eup %1794  ;;  %1796 = vtanh.f32 %v408_v47  ;;  %v434_v52 = vmul.f32 0.5, %v1793_v49  ;;  %v2478_v47 = vld [vmem:[#allocation4 + $0x188] sm:$0xff]  ;;  %v2480_v49 = vld [vmem:[#allocation4 + $0x190] sm:$0xff] }
 0x1d0   :  { %v436_v53 = vmul.f32 0.5, %v1795_v51  ;;  %1798 = vtanh.f32 %v428_v50  ;;  %v2484_v50 = vld [vmem:[#allocation4 + $0x198] sm:$0xff]  ;;  %v2488_v51 = vld [vmem:[#allocation4 + $0x160] sm:$0xff] }
 0x1d1   :  { %v435_v62 = vadd.f32 0.5, %v434_v52  ;;  %v2490_v52 = vld [vmem:[#allocation4 + $0x168] sm:$0xff] }
 0x1d2   :  { %v437_v56 = vadd.f32 0.5, %v436_v53  ;;  %v2492_v53 = vld [vmem:[#allocation4 + $0x170] sm:$0xff] }
 0x1d4   :  { %v440_v3 = vmul.f32 %v437_v56, %v2352_v48  ;;  %v2496_v56 = vld [vmem:[#allocation4 + $0x178] sm:$0xff] }
 0x1d5   :  { %v1797_v0 = vpop.eup %1796 }
 0x1d6   :  { %v441_v2 = vmul.f32 %v1797_v0, %v435_v62  ;;  %v1799_v61 = vpop.eup %1798  ;;  %v2500_v62 = vld [vmem:[#allocation4 + $0x140] sm:$0xff]  ;;  %v2504_v0 = vld [vmem:[#allocation4 + $0x150] sm:$0xff] }
 0x1d7   :  { %v438_v5 = vmul.f32 0.5, %v1799_v61  ;;  %v2512_v61 = vld [vmem:[#allocation4 + $0x120] sm:$0xff] }
 0x1d8   :  { %v442_v14 = vadd.f32 %v441_v2, %v440_v3  ;;  %v2502_v3 = vld [vmem:[#allocation4 + $0x148] sm:$0xff]  ;;  %v2508_v2 = vld [vmem:[#allocation4 + $0x158] sm:$0xff] }
 0x1d9   :  { %v439_v1 = vadd.f32 0.5, %v438_v5  ;;  %v2520_v5 = vld [vmem:[#allocation4 + $0x138] sm:$0xff] }
 0x1da   :  { %1800 = vtanh.f32 %v442_v14  ;;  %v446_v7 = vsel %vm445_vm3, %v442_v14, %v2352_v48  ;;  %v2514_v14 = vld [vmem:[#allocation4 + $0x128] sm:$0xff] }
 0x1e0   :  { %v1801_v55 = vpop.eup %1800 }
 0x1e1   :  { %v444_v60 = vmul.f32 %v1801_v55, %v439_v1  ;;  %v2524_v1 = vld [vmem:[#allocation4 + $0x100] sm:$0xff]  ;;  %v2526_v55 = vld [vmem:[#allocation4 + $0x108] sm:$0xff] }
 0x1e3   :  { %v447_v39 = vsel %vm445_vm3, %v444_v60, %v2355_v54  ;;  %v2443_v54 = vld [vmem:[#allocation4 + $0x1f8] sm:$0xff]  ;;  %v2528_v60 = vld [vmem:[#allocation4 + $0x110] sm:$0xff] }
 0x1e4   :  { %472 = vmatmul.f32.vlgmr.msra.gmra.mxu0 %v447_v39  ;;  %492 = vmatmul.f32.vlgmr.msra.gmra.mxu1 %v447_v39 }
 0x1e5   :  { %512 = vmatmul.f32.vlgmr.msrb.gmra.mxu2 %v447_v39  ;;  %532 = vmatmul.f32.vlgmr.msrb.gmra.mxu3 %v447_v39  ;;  %v2532_v39 = vld [vmem:[#allocation4 + $0x118] sm:$0xff] }
 0x1e6   :  { %792 = vmatpush.msra.mxu0 %v2435_v58  ;;  %812 = vmatpush.msra.mxu1 %v2437_v6 }
 0x1e7   :  { %832 = vmatpush.msrb.mxu2 %v2439_v57  ;;  %852 = vmatpush.msrb.mxu3 %v2443_v54 }
 0x1e8   :  { %793 = vmatpush.msra.mxu0 %v2452_v37  ;;  %813 = vmatpush.msra.mxu1 %v2454_v38 }
 0x1e9   :  { %833 = vmatpush.msrb.mxu2 %v2456_v40  ;;  %853 = vmatpush.msrb.mxu3 %v2460_v41 }
 0x1ea   :  { %794 = vmatpush.msra.mxu0 %v2464_v42  ;;  %814 = vmatpush.msra.mxu1 %v2466_v43 }
 0x1eb   :  { %834 = vmatpush.msrb.mxu2 %v2468_v44  ;;  %854 = vmatpush.msrb.mxu3 %v2472_v45 }
 0x1ec   :  { %795 = vmatpush.msra.mxu0 %v2476_v46  ;;  %815 = vmatpush.msra.mxu1 %v2478_v47 }
 0x1ed   :  { %835 = vmatpush.msrb.mxu2 %v2480_v49  ;;  %855 = vmatpush.msrb.mxu3 %v2484_v50 }
 0x1ee   :  { %796 = vmatpush.msra.mxu0 %v2488_v51  ;;  %816 = vmatpush.msra.mxu1 %v2490_v52 }
 0x1ef   :  { %836 = vmatpush.msrb.mxu2 %v2492_v53  ;;  %856 = vmatpush.msrb.mxu3 %v2496_v56 }
 0x1f0   :  { %797 = vmatpush.msra.mxu0 %v2500_v62  ;;  %817 = vmatpush.msra.mxu1 %v2502_v3 }
 0x1f1   :  { %837 = vmatpush.msrb.mxu2 %v2504_v0  ;;  %857 = vmatpush.msrb.mxu3 %v2508_v2 }
 0x1f2   :  { %798 = vmatpush.msra.mxu0 %v2512_v61  ;;  %818 = vmatpush.msra.mxu1 %v2514_v14 }
 0x1f3   :  { %858 = vmatpush.msrb.mxu3 %v2520_v5 }
 0x1f4   :  { %799 = vmatpush.msra.mxu0 %v2524_v1  ;;  %819 = vmatpush.msra.mxu1 %v2526_v55 }
 0x1f5   :  { %859 = vmatpush.msrb.mxu3 %v2532_v39 }
 0x261   :  { %v473_v48 = vpop.f32.mrf.mxu0  ;;  %v493_v63 = vpop.f32.mrf.mxu1 }
 0x262   :  { %v474_v10 = vadd.f32 %v473_v48, %v448_v9  ;;  %v494_v11 = vadd.f32 %v493_v63, %v449_v4  ;;  %v2536_v9 = vld [vmem:[#allocation4 + $0xe0] sm:$0xff]  ;;  %v2538_v4 = vld [vmem:[#allocation4 + $0xe8] sm:$0xff]  ;;  %v2540_v48 = vld [vmem:[#allocation4 + $0xf0] sm:$0xff] }
 0x263   :  { %800 = vmatpush.msra.mxu0 %v2536_v9  ;;  %820 = vmatpush.msra.mxu1 %v2538_v4  ;;  %v2544_v63 = vld [vmem:[#allocation4 + $0xf8] sm:$0xff] }
 0x264   :  { %1802 = vtanh.f32 %v474_v10  ;;  %860 = vmatpush.msrb.mxu3 %v2544_v63  ;;  %v2548_v10 = vld [vmem:[#allocation4 + $0xc0] sm:$0xff] }
 0x265   :  { %1804 = vtanh.f32 %v494_v11  ;;  %v2550_v11 = vld [vmem:[#allocation4 + $0xc8] sm:$0xff]  ;;  %801 = vmatpush.msra.mxu0 %v2548_v10 }
 0x266   :  { %821 = vmatpush.msra.mxu1 %v2550_v11 }
 0x268   :  { %v513_v15 = vpop.f32.mrf.mxu2  ;;  %v533_v17 = vpop.f32.mrf.mxu3 }
 0x269   :  { %v514_v18 = vadd.f32 %v513_v15, %v450_v12  ;;  %v534_v20 = vadd.f32 %v533_v17, %v451_v16  ;;  %v2552_v12 = vld [vmem:[#allocation4 + $0xd0] sm:$0xff]  ;;  %v2556_v15 = vld [vmem:[#allocation4 + $0xd8] sm:$0xff]  ;;  %v2560_v16 = vld [vmem:[#allocation4 + $0xa0] sm:$0xff] }
 0x26a   :  { %v1803_v19 = vpop.eup %1802  ;;  %861 = vmatpush.msrb.mxu3 %v2556_v15  ;;  %v2562_v17 = vld [vmem:[#allocation4 + $0xa8] sm:$0xff]  ;;  %802 = vmatpush.msra.mxu0 %v2560_v16 }
 0x26b   :  { %v1805_v21 = vpop.eup %1804  ;;  %1806 = vtanh.f32 %v514_v18  ;;  %v540_v22 = vmul.f32 0.5, %v1803_v19  ;;  %v2564_v18 = vld [vmem:[#allocation4 + $0xb0] sm:$0xff]  ;;  %822 = vmatpush.msra.mxu1 %v2562_v17  ;;  %v2568_v19 = vld [vmem:[#allocation4 + $0xb8] sm:$0xff] }
 0x26c   :  { %v542_v23 = vmul.f32 0.5, %v1805_v21  ;;  %1808 = vtanh.f32 %v534_v20  ;;  %862 = vmatpush.msrb.mxu3 %v2568_v19  ;;  %v2572_v20 = vld [vmem:[#allocation4 + $0x80] sm:$0xff]  ;;  %v2574_v21 = vld [vmem:[#allocation4 + $0x88] sm:$0xff] }
 0x26d   :  { %v541_v25 = vadd.f32 0.5, %v540_v22  ;;  %3398 = vst [vmem:[#allocation7_spill] sm:$0xff] %v2572_v20  ;;  %v2576_v22 = vld [vmem:[#allocation4 + $0x90] sm:$0xff]  ;;  %803 = vmatpush.msra.mxu0 %v2572_v20  ;;  %823 = vmatpush.msra.mxu1 %v2574_v21 }
 0x26e   :  { %v543_v24 = vadd.f32 0.5, %v542_v23  ;;  %3399 = vst [vmem:[#allocation8_spill] sm:$0xff] %v2574_v21  ;;  %v2580_v23 = vld [vmem:[#allocation4 + $0x98] sm:$0xff] }
 0x26f   :  { %3400 = vst [vmem:[#allocation9_spill] sm:$0xff] %v2576_v22  ;;  %863 = vmatpush.msrb.mxu3 %v2580_v23 }
 0x270   :  { %v546_v26 = vmul.f32 %v543_v24, %v446_v7  ;;  %v2516_v7 = vld [vmem:[#allocation4 + $0x130] sm:$0xff]  ;;  %3401 = vst [vmem:[#allocation41_spill] sm:$0xff] %v2580_v23  ;;  %v2584_v24 = vld [vmem:[#allocation4 + $0x60] sm:$0xff] }
 0x271   :  { %v1807_v27 = vpop.eup %1806  ;;  %838 = vmatpush.msrb.mxu2 %v2516_v7  ;;  %3402 = vst [vmem:[#allocation10_spill] sm:$0xff] %v2584_v24  ;;  %804 = vmatpush.msra.mxu0 %v2584_v24 }
 0x272   :  { %v547_v28 = vmul.f32 %v1807_v27, %v541_v25  ;;  %v1809_v29 = vpop.eup %1808  ;;  %v2586_v25 = vld [vmem:[#allocation4 + $0x68] sm:$0xff]  ;;  %v2592_v27 = vld [vmem:[#allocation4 + $0x78] sm:$0xff] }
 0x273   :  { %v544_v31 = vmul.f32 0.5, %v1809_v29  ;;  %839 = vmatpush.msrb.mxu2 %v2528_v60  ;;  %3403 = vst [vmem:[#allocation11_spill] sm:$0xff] %v2586_v25  ;;  %824 = vmatpush.msra.mxu1 %v2586_v25  ;;  %v2598_v29 = vld [vmem:[#allocation4 + $0x48] sm:$0xff] }
 0x274   :  { %v2449_v30 = vadd.f32 %v547_v28, %v546_v26  ;;  %v2588_v26 = vld [vmem:[#allocation4 + $0x70] sm:$0xff]  ;;  %3405 = vst [vmem:[#allocation13_spill] sm:$0xff] %v2592_v27  ;;  %864 = vmatpush.msrb.mxu3 %v2592_v27  ;;  %v2596_v28 = vld [vmem:[#allocation4 + $0x40] sm:$0xff]  ;;  %v2616_v27 = vld [vmem:[#allocation4 + $0x38] sm:$0xff] }
 0x275   :  { %v545_v32 = vadd.f32 0.5, %v544_v31  ;;  %840 = vmatpush.msrb.mxu2 %v2540_v48  ;;  %3404 = vst [vmem:[#allocation12_spill] sm:$0xff] %v2588_v26  ;;  %v2600_v31 = vld [vmem:[#allocation4 + $0x50] sm:$0xff]  ;;  %805 = vmatpush.msra.mxu0 %v2596_v28 }
 0x276   :  { %1810 = vtanh.f32 %v2449_v30  ;;  %3406 = vst [vmem:[#allocation14_spill] sm:$0xff] %v2596_v28  ;;  %825 = vmatpush.msra.mxu1 %v2598_v29  ;;  %v2628_v28 = vld [vmem:[#allocation4 + $0x18] sm:$0xff] }
 0x277   :  { %841 = vmatpush.msrb.mxu2 %v2552_v12  ;;  %3407 = vst [vmem:[#allocation15_spill] sm:$0xff] %v2598_v29  ;;  %v2620_v29 = vld [vmem:[#allocation4] sm:$0xff] }
 0x278   :  { %3408 = vst [vmem:[#allocation16_spill] sm:$0xff] %v2600_v31 }
 0x279   :  { %842 = vmatpush.msrb.mxu2 %v2564_v18  ;;  %3413 = vst [vmem:[#allocation21_spill] sm:$0xff] %v2616_v27 }
 0x27a   :  { %3414 = vst [vmem:[#allocation22_spill] sm:$0xff] %v2620_v29 }
 0x27b   :  { %843 = vmatpush.msrb.mxu2 %v2576_v22  ;;  %3417 = vst [vmem:[#allocation25_spill] sm:$0xff] %v2628_v28 }
 0x27c   :  { %v1811_v33 = vpop.eup %1810 }
 0x27d   :  { %v550_v35 = vmul.f32 %v1811_v33, %v545_v32  ;;  %844 = vmatpush.msrb.mxu2 %v2588_v26  ;;  %v2604_v32 = vld [vmem:[#allocation4 + $0x58] sm:$0xff]  ;;  %v2608_v33 = vld [vmem:[#allocation4 + $0x20] sm:$0xff] }
 0x27e   :  { %3409 = vst [vmem:[#allocation17_spill] sm:$0xff] %v2604_v32  ;;  %865 = vmatpush.msrb.mxu3 %v2604_v32  ;;  %806 = vmatpush.msra.mxu0 %v2608_v33  ;;  %v2624_v32 = vld [vmem:[#allocation4 + $0x10] sm:$0xff] }
 0x27f   :  { %551 = vst [vmem:[#allocation2] sm:$0x1] %v550_v35  ;;  %640 = vmatmul.f32.vlgmr.msrb.gmra.mxu0 %v550_v35  ;;  %660 = vmatmul.f32.vlgmr.msrb.gmra.mxu1 %v550_v35 }
 0x280   :  { %680 = vmatmul.f32.vlgmr.msra.gmra.mxu2 %v550_v35  ;;  %700 = vmatmul.f32.vlgmr.msra.gmra.mxu3 %v550_v35  ;;  %3410 = vst [vmem:[#allocation18_spill] sm:$0xff] %v2608_v33  ;;  %v2610_v35 = vld [vmem:[#allocation4 + $0x28] sm:$0xff]  ;;  %v617_v33 = vrot.slane %v3397_v36, 4 }
 0x281   :  { %845 = vmatpush.msrb.mxu2 %v2600_v31  ;;  %3411 = vst [vmem:[#allocation19_spill] sm:$0xff] %v2610_v35  ;;  %826 = vmatpush.msra.mxu1 %v2610_v35  ;;  %v2622_v31 = vld [vmem:[#allocation4 + $0x8] sm:$0xff]  ;;  %v616_v35 = vrot.slane %v3396_v34, 4 }
 0x282   :  { %866 = vmatpush.msrb.mxu3 %v2616_v27  ;;  %3415 = vst [vmem:[#allocation23_spill] sm:$0xff] %v2622_v31  ;;  %807 = vmatpush.msra.mxu0 %v2620_v29 }
 0x283   :  { %846 = vmatpush.msrb.mxu2 %v2612_v13  ;;  %3416 = vst [vmem:[#allocation24_spill] sm:$0xff] %v2624_v32  ;;  %827 = vmatpush.msra.mxu1 %v2622_v31 }
 0x284   :  { %867 = vmatpush.msrb.mxu3 %v2628_v28  ;;  %960 = vmatpush.msrb.mxu0 %v2435_v58 }
 0x285   :  { %847 = vmatpush.msrb.mxu2 %v2624_v32  ;;  %980 = vmatpush.msrb.mxu1 %v2437_v6 }
 0x286   :  { %1020 = vmatpush.msra.mxu3 %v2443_v54  ;;  %961 = vmatpush.msrb.mxu0 %v2452_v37 }
 0x287   :  { %1000 = vmatpush.msra.mxu2 %v2439_v57  ;;  %981 = vmatpush.msrb.mxu1 %v2454_v38 }
 0x288   :  { %1021 = vmatpush.msra.mxu3 %v2460_v41  ;;  %962 = vmatpush.msrb.mxu0 %v2464_v42 }
 0x289   :  { %1001 = vmatpush.msra.mxu2 %v2456_v40  ;;  %982 = vmatpush.msrb.mxu1 %v2466_v43 }
 0x28a   :  { %1022 = vmatpush.msra.mxu3 %v2472_v45  ;;  %963 = vmatpush.msrb.mxu0 %v2476_v46 }
 0x28b   :  { %1002 = vmatpush.msra.mxu2 %v2468_v44  ;;  %983 = vmatpush.msrb.mxu1 %v2478_v47 }
 0x28c   :  { %1023 = vmatpush.msra.mxu3 %v2484_v50  ;;  %964 = vmatpush.msrb.mxu0 %v2488_v51 }
 0x28d   :  { %1003 = vmatpush.msra.mxu2 %v2480_v49  ;;  %984 = vmatpush.msrb.mxu1 %v2490_v52 }
 0x28e   :  { %1024 = vmatpush.msra.mxu3 %v2496_v56  ;;  %965 = vmatpush.msrb.mxu0 %v2500_v62 }
 0x28f   :  { %1004 = vmatpush.msra.mxu2 %v2492_v53  ;;  %985 = vmatpush.msrb.mxu1 %v2502_v3 }
 0x290   :  { %1025 = vmatpush.msra.mxu3 %v2508_v2  ;;  %966 = vmatpush.msrb.mxu0 %v2512_v61 }
 0x291   :  { %1005 = vmatpush.msra.mxu2 %v2504_v0  ;;  %986 = vmatpush.msrb.mxu1 %v2514_v14 }
 0x292   :  { %1026 = vmatpush.msra.mxu3 %v2520_v5  ;;  %967 = vmatpush.msrb.mxu0 %v2524_v1 }
 0x293   :  { %1006 = vmatpush.msra.mxu2 %v2516_v7  ;;  %987 = vmatpush.msrb.mxu1 %v2526_v55 }
 0x294   :  { %1027 = vmatpush.msra.mxu3 %v2532_v39  ;;  %968 = vmatpush.msrb.mxu0 %v2536_v9 }
 0x295   :  { %1007 = vmatpush.msra.mxu2 %v2528_v60  ;;  %988 = vmatpush.msrb.mxu1 %v2538_v4 }
 0x296   :  { %1028 = vmatpush.msra.mxu3 %v2544_v63  ;;  %969 = vmatpush.msrb.mxu0 %v2548_v10 }
 0x297   :  { %1008 = vmatpush.msra.mxu2 %v2540_v48  ;;  %989 = vmatpush.msrb.mxu1 %v2550_v11 }
 0x298   :  { %1029 = vmatpush.msra.mxu3 %v2556_v15  ;;  %970 = vmatpush.msrb.mxu0 %v2560_v16 }
 0x299   :  { %1009 = vmatpush.msra.mxu2 %v2552_v12  ;;  %990 = vmatpush.msrb.mxu1 %v2562_v17 }
 0x29a   :  { %1030 = vmatpush.msra.mxu3 %v2568_v19  ;;  %971 = vmatpush.msrb.mxu0 %v2572_v20 }
 0x29b   :  { %1010 = vmatpush.msra.mxu2 %v2564_v18  ;;  %991 = vmatpush.msrb.mxu1 %v2574_v21 }
 0x29c   :  { %1031 = vmatpush.msra.mxu3 %v2580_v23  ;;  %972 = vmatpush.msrb.mxu0 %v2584_v24  ;;  %v3426_v24 = vld [vmem:[#allocation19_spill] sm:$0xff] }
 0x29d   :  { %1011 = vmatpush.msra.mxu2 %v2576_v22  ;;  %992 = vmatpush.msrb.mxu1 %v2586_v25  ;;  %v3427_v25 = vld [vmem:[#allocation20_spill] sm:$0xff] }
 0x2fc   :  { %v641_v27 = vpop.f32.mrf.mxu0  ;;  %v661_v13 = vpop.f32.mrf.mxu1 }
 0x2fd   :  { %v642_v26 = vadd.f32 %v641_v27, %v616_v35  ;;  %v662_v29 = vadd.f32 %v661_v13, %v617_v33  ;;  %v618_v13 = vrot.slane %v3371_v59, 4  ;;  %v619_v27 = vrot.slane %v3372_v8, 4 }
 0x2ff   :  { %1812 = vtanh.f32 %v642_v26 }
 0x300   :  { %1814 = vtanh.f32 %v662_v29 }
 0x303   :  { %v681_v26 = vpop.f32.mrf.mxu2  ;;  %v701_v33 = vpop.f32.mrf.mxu3 }
 0x304   :  { %v682_v29 = vadd.f32 %v681_v26, %v618_v13  ;;  %v702_v36 = vadd.f32 %v701_v33, %v619_v27  ;;  %v3419_v33 = vld [vmem:[#allocation12_spill] sm:$0xff] }
 0x305   :  { %v1813_v35 = vpop.eup %1812  ;;  %1012 = vmatpush.msra.mxu2 %v3419_v33  ;;  %v3428_v33 = vld [vmem:[#allocation21_spill] sm:$0xff] }
 0x306   :  { %v1815_v59 = vpop.eup %1814  ;;  %1816 = vtanh.f32 %v682_v29  ;;  %v708_v8 = vmul.f32 0.5, %v1813_v35  ;;  %v3420_v29 = vld [vmem:[#allocation13_spill] sm:$0xff] }
 0x307   :  { %v710_v34 = vmul.f32 0.5, %v1815_v59  ;;  %1818 = vtanh.f32 %v702_v36  ;;  %1032 = vmatpush.msra.mxu3 %v3420_v29 }
 0x308   :  { %v709_v26 = vadd.f32 0.5, %v708_v8 }
 0x309   :  { %v711_v13 = vadd.f32 0.5, %v710_v34 }
 0x30b   :  { %v714_v34 = vmul.f32 %v711_v13, %v2449_v30  ;;  %v3421_v13 = vld [vmem:[#allocation14_spill] sm:$0xff] }
 0x30c   :  { %v1817_v59 = vpop.eup %1816  ;;  %973 = vmatpush.msrb.mxu0 %v3421_v13 }
 0x30d   :  { %v715_v36 = vmul.f32 %v1817_v59, %v709_v26  ;;  %v1819_v8 = vpop.eup %1818  ;;  %v3422_v26 = vld [vmem:[#allocation15_spill] sm:$0xff] }
 0x30e   :  { %v712_v30 = vmul.f32 0.5, %v1819_v8  ;;  %993 = vmatpush.msrb.mxu1 %v3422_v26 }
 0x30f   :  { %v2675_v27 = vadd.f32 %v715_v36, %v714_v34  ;;  %v3423_v34 = vld [vmem:[#allocation16_spill] sm:$0xff]  ;;  %v3424_v36 = vld [vmem:[#allocation17_spill] sm:$0xff] }
 0x310   :  { %v713_v35 = vadd.f32 0.5, %v712_v30  ;;  %1013 = vmatpush.msra.mxu2 %v3423_v34  ;;  %1033 = vmatpush.msra.mxu3 %v3424_v36  ;;  %v3429_v30 = vld [vmem:[#allocation22_spill] sm:$0xff] }
 0x311   :  { %3418 = vst [vmem:[#allocation26_spill] sm:$0xff] %v2675_v27  ;;  %1820 = vtanh.f32 %v2675_v27  ;;  %v3425_v27 = vld [vmem:[#allocation18_spill] sm:$0xff]  ;;  %994 = vmatpush.msrb.mxu1 %v3426_v24 }
 0x312   :  { %974 = vmatpush.msrb.mxu0 %v3425_v27  ;;  %1014 = vmatpush.msra.mxu2 %v3427_v25 }
 0x313   :  { %1034 = vmatpush.msra.mxu3 %v3428_v33  ;;  %995 = vmatpush.msrb.mxu1 %v2622_v31 }
 0x314   :  { %975 = vmatpush.msrb.mxu0 %v3429_v30  ;;  %1015 = vmatpush.msra.mxu2 %v2624_v32 }
 0x315   :  { %1035 = vmatpush.msra.mxu3 %v2628_v28 }
 0x317   :  { %v1821_v59 = vpop.eup %1820 }
 0x318   :  { %v718_v8 = vmul.f32 %v1821_v59, %v713_v35  ;;  %v3430_v35 = vld [vmem:[#allocation10_spill] sm:$0xff]  ;;  %v3431_v59 = vld [vmem:[#allocation11_spill] sm:$0xff] }
 0x31a   :  { %719 = vst [vmem:[#allocation2 + $0x1] sm:$0x1] %v718_v8  ;;  %808 = vmatmul.f32.vlgmr.msra.gmra.mxu0 %v718_v8  ;;  %828 = vmatmul.f32.vlgmr.msra.gmra.mxu1 %v718_v8 }
 0x31b   :  { %848 = vmatmul.f32.vlgmr.msrb.gmra.mxu2 %v718_v8  ;;  %868 = vmatmul.f32.vlgmr.msrb.gmra.mxu3 %v718_v8  ;;  %v3432_v8 = vld [vmem:[#allocation12_spill] sm:$0xff] }
 0x31c   :  { %1128 = vmatpush.msra.mxu0 %v2435_v58  ;;  %1148 = vmatpush.msra.mxu1 %v2437_v6 }
 0x31d   :  { %1168 = vmatpush.msrb.mxu2 %v2439_v57  ;;  %1188 = vmatpush.msrb.mxu3 %v2443_v54 }
 0x31e   :  { %1129 = vmatpush.msra.mxu0 %v2452_v37  ;;  %1149 = vmatpush.msra.mxu1 %v2454_v38 }
 0x31f   :  { %1169 = vmatpush.msrb.mxu2 %v2456_v40  ;;  %1189 = vmatpush.msrb.mxu3 %v2460_v41 }
 0x320   :  { %1130 = vmatpush.msra.mxu0 %v2464_v42  ;;  %1150 = vmatpush.msra.mxu1 %v2466_v43 }
 0x321   :  { %1170 = vmatpush.msrb.mxu2 %v2468_v44  ;;  %1190 = vmatpush.msrb.mxu3 %v2472_v45 }
 0x322   :  { %1131 = vmatpush.msra.mxu0 %v2476_v46  ;;  %1151 = vmatpush.msra.mxu1 %v2478_v47 }
 0x323   :  { %1171 = vmatpush.msrb.mxu2 %v2480_v49  ;;  %1191 = vmatpush.msrb.mxu3 %v2484_v50 }
 0x324   :  { %1132 = vmatpush.msra.mxu0 %v2488_v51  ;;  %1152 = vmatpush.msra.mxu1 %v2490_v52 }
 0x325   :  { %1172 = vmatpush.msrb.mxu2 %v2492_v53  ;;  %1192 = vmatpush.msrb.mxu3 %v2496_v56 }
 0x326   :  { %1133 = vmatpush.msra.mxu0 %v2500_v62  ;;  %1153 = vmatpush.msra.mxu1 %v2502_v3 }
 0x327   :  { %1173 = vmatpush.msrb.mxu2 %v2504_v0  ;;  %1193 = vmatpush.msrb.mxu3 %v2508_v2 }
 0x328   :  { %1134 = vmatpush.msra.mxu0 %v2512_v61  ;;  %1154 = vmatpush.msra.mxu1 %v2514_v14 }
 0x329   :  { %1174 = vmatpush.msrb.mxu2 %v2516_v7  ;;  %1194 = vmatpush.msrb.mxu3 %v2520_v5 }
 0x32a   :  { %1135 = vmatpush.msra.mxu0 %v2524_v1  ;;  %1155 = vmatpush.msra.mxu1 %v2526_v55 }
 0x32b   :  { %1175 = vmatpush.msrb.mxu2 %v2528_v60  ;;  %1195 = vmatpush.msrb.mxu3 %v2532_v39 }
 0x32c   :  { %1136 = vmatpush.msra.mxu0 %v2536_v9  ;;  %1156 = vmatpush.msra.mxu1 %v2538_v4 }
 0x32d   :  { %1176 = vmatpush.msrb.mxu2 %v2540_v48  ;;  %1196 = vmatpush.msrb.mxu3 %v2544_v63 }
 0x32e   :  { %1137 = vmatpush.msra.mxu0 %v2548_v10  ;;  %1157 = vmatpush.msra.mxu1 %v2550_v11 }
 0x32f   :  { %1177 = vmatpush.msrb.mxu2 %v2552_v12  ;;  %1197 = vmatpush.msrb.mxu3 %v2556_v15 }
 0x330   :  { %1138 = vmatpush.msra.mxu0 %v2560_v16  ;;  %1158 = vmatpush.msra.mxu1 %v2562_v17 }
 0x331   :  { %1178 = vmatpush.msrb.mxu2 %v2564_v18  ;;  %1198 = vmatpush.msrb.mxu3 %v2568_v19 }
 0x332   :  { %1139 = vmatpush.msra.mxu0 %v2572_v20  ;;  %1159 = vmatpush.msra.mxu1 %v2574_v21 }
 0x333   :  { %1179 = vmatpush.msrb.mxu2 %v2576_v22  ;;  %1199 = vmatpush.msrb.mxu3 %v2580_v23 }
 0x334   :  { %1140 = vmatpush.msra.mxu0 %v3430_v35  ;;  %1160 = vmatpush.msra.mxu1 %v3431_v59 }
 0x335   :  { %1180 = vmatpush.msrb.mxu2 %v3432_v8  ;;  %1200 = vmatpush.msrb.mxu3 %v3420_v29 }
 0x336   :  { %1141 = vmatpush.msra.mxu0 %v3421_v13  ;;  %1161 = vmatpush.msra.mxu1 %v3422_v26  ;;  %v3433_v26 = vld [vmem:[#allocation33_spill] sm:$0xff]  ;;  %v3434_v13 = vld [vmem:[#allocation38_spill] sm:$0xff] }
 0x337   :  { %1181 = vmatpush.msrb.mxu2 %v3423_v34  ;;  %1201 = vmatpush.msrb.mxu3 %v3424_v36  ;;  %v784_v34 = vrot.slane %v3433_v26, 5  ;;  %v785_v36 = vrot.slane %v3434_v13, 5 }
 0x338   :  { %1142 = vmatpush.msra.mxu0 %v3425_v27  ;;  %1162 = vmatpush.msra.mxu1 %v3426_v24 }
 0x339   :  { %1182 = vmatpush.msrb.mxu2 %v3427_v25  ;;  %1202 = vmatpush.msrb.mxu3 %v3428_v33  ;;  %v3435_v25 = vld [vmem:[#allocation37_spill] sm:$0xff] }
 0x33a   :  { %1143 = vmatpush.msra.mxu0 %v3429_v30  ;;  %1163 = vmatpush.msra.mxu1 %v2622_v31  ;;  %v786_v33 = vrot.slane %v3435_v25, 5  ;;  %v3436_v30 = vld [vmem:[#allocation39_spill] sm:$0xff] }
 0x33b   :  { %1183 = vmatpush.msrb.mxu2 %v2624_v32  ;;  %1203 = vmatpush.msrb.mxu3 %v2628_v28  ;;  %v787_v35 = vrot.slane %v3436_v30, 5 }
 0x397   :  { %v809_v29 = vpop.f32.mrf.mxu0  ;;  %v829_v27 = vpop.f32.mrf.mxu1 }
 0x398   :  { %v810_v8 = vadd.f32 %v809_v29, %v784_v34  ;;  %v830_v24 = vadd.f32 %v829_v27, %v785_v36  ;;  %v3437_v27 = vld [vmem:[#allocation26_spill] sm:$0xff] }
 0x39a   :  { %1822 = vtanh.f32 %v810_v8 }
 0x39b   :  { %1824 = vtanh.f32 %v830_v24 }
 0x39e   :  { %v849_v59 = vpop.f32.mrf.mxu2  ;;  %v869_v31 = vpop.f32.mrf.mxu3 }
 0x39f   :  { %v850_v23 = vadd.f32 %v849_v59, %v786_v33  ;;  %v870_v22 = vadd.f32 %v869_v31, %v787_v35  ;;  %v2849_v35 = vld [vmem:[#allocation4 + $0x1e8] sm:$0xff] }
 0x3a0   :  { %v1823_v32 = vpop.eup %1822 }
 0x3a1   :  { %v1825_v28 = vpop.eup %1824  ;;  %1826 = vtanh.f32 %v850_v23  ;;  %v876_v26 = vmul.f32 0.5, %v1823_v32 }
 0x3a2   :  { %v878_v21 = vmul.f32 0.5, %v1825_v28  ;;  %1828 = vtanh.f32 %v870_v22 }
 0x3a3   :  { %v877_v20 = vadd.f32 0.5, %v876_v26 }
 0x3a4   :  { %v879_v13 = vadd.f32 0.5, %v878_v21 }
 0x3a6   :  { %v882_v34 = vmul.f32 %v879_v13, %v3437_v27 }
 0x3a7   :  { %v1827_v29 = vpop.eup %1826 }
 0x3a8   :  { %v883_v24 = vmul.f32 %v1827_v29, %v877_v20  ;;  %v1829_v36 = vpop.eup %1828  ;;  %v2851_v29 = vld [vmem:[#allocation4 + $0x1f0] sm:$0xff] }
 0x3a9   :  { %v880_v30 = vmul.f32 0.5, %v1829_v36 }
 0x3aa   :  { %v2773_v8 = vadd.f32 %v883_v24, %v882_v34  ;;  %v2855_v24 = vld [vmem:[#allocation4 + $0x1f8] sm:$0xff] }
 0x3ab   :  { %v881_v33 = vadd.f32 0.5, %v880_v30  ;;  %v2847_v30 = vld [vmem:[#allocation4 + $0x1e0] sm:$0xff] }
 0x3ac   :  { %1830 = vtanh.f32 %v2773_v8 }
 0x3b2   :  { %v1831_v59 = vpop.eup %1830 }
 0x3b3   :  { %v886_v31 = vmul.f32 %v1831_v59, %v881_v33  ;;  %v1122_v33 = vrot.slane %v3435_v25, 7 }
 0x3b5   :  { %887 = vst [vmem:[#allocation2 + $0x2] sm:$0x1] %v886_v31  ;;  %976 = vmatmul.f32.vlgmr.msrb.gmra.mxu0 %v886_v31  ;;  %996 = vmatmul.f32.vlgmr.msrb.gmra.mxu1 %v886_v31 }
 0x3b6   :  { %1016 = vmatmul.f32.vlgmr.msra.gmra.mxu2 %v886_v31  ;;  %1036 = vmatmul.f32.vlgmr.msra.gmra.mxu3 %v886_v31 }
 0x3b7   :  { %1288 = vmatpush.msrb.mxu0 %v2435_v58  ;;  %1308 = vmatpush.msrb.mxu1 %v2437_v6  ;;  %v3438_v58 = vld [vmem:[#allocation7_spill] sm:$0xff]  ;;  %v3439_v6 = vld [vmem:[#allocation8_spill] sm:$0xff] }
 0x3b8   :  { %1328 = vmatpush.msra.mxu2 %v2439_v57  ;;  %1348 = vmatpush.msra.mxu3 %v2443_v54  ;;  %v3440_v57 = vld [vmem:[#allocation9_spill] sm:$0xff] }
 0x3b9   :  { %1289 = vmatpush.msrb.mxu0 %v2452_v37  ;;  %1309 = vmatpush.msrb.mxu1 %v2454_v38  ;;  %v3441_v54 = vld [vmem:[#allocation41_spill] sm:$0xff]  ;;  %v3442_v37 = vld [vmem:[#allocation10_spill] sm:$0xff]  ;;  %v3443_v38 = vld [vmem:[#allocation11_spill] sm:$0xff] }
 0x3ba   :  { %1329 = vmatpush.msra.mxu2 %v2456_v40  ;;  %1349 = vmatpush.msra.mxu3 %v2460_v41  ;;  %v3444_v40 = vld [vmem:[#allocation12_spill] sm:$0xff]  ;;  %v3445_v41 = vld [vmem:[#allocation13_spill] sm:$0xff] }
 0x3bb   :  { %1290 = vmatpush.msrb.mxu0 %v2464_v42  ;;  %1310 = vmatpush.msrb.mxu1 %v2466_v43  ;;  %v3446_v42 = vld [vmem:[#allocation14_spill] sm:$0xff]  ;;  %v3447_v43 = vld [vmem:[#allocation15_spill] sm:$0xff] }
 0x3bc   :  { %1330 = vmatpush.msra.mxu2 %v2468_v44  ;;  %1350 = vmatpush.msra.mxu3 %v2472_v45  ;;  %v3448_v44 = vld [vmem:[#allocation16_spill] sm:$0xff]  ;;  %v3449_v45 = vld [vmem:[#allocation17_spill] sm:$0xff] }
 0x3bd   :  { %1291 = vmatpush.msrb.mxu0 %v2476_v46  ;;  %1311 = vmatpush.msrb.mxu1 %v2478_v47  ;;  %v3450_v46 = vld [vmem:[#allocation18_spill] sm:$0xff]  ;;  %v3451_v47 = vld [vmem:[#allocation19_spill] sm:$0xff] }
 0x3be   :  { %1331 = vmatpush.msra.mxu2 %v2480_v49  ;;  %1351 = vmatpush.msra.mxu3 %v2484_v50  ;;  %v3452_v49 = vld [vmem:[#allocation20_spill] sm:$0xff]  ;;  %v3453_v50 = vld [vmem:[#allocation21_spill] sm:$0xff] }
 0x3bf   :  { %1292 = vmatpush.msrb.mxu0 %v2488_v51  ;;  %1312 = vmatpush.msrb.mxu1 %v2490_v52  ;;  %v3454_v51 = vld [vmem:[#allocation22_spill] sm:$0xff]  ;;  %v3455_v52 = vld [vmem:[#allocation23_spill] sm:$0xff] }
 0x3c0   :  { %1332 = vmatpush.msra.mxu2 %v2492_v53  ;;  %1352 = vmatpush.msra.mxu3 %v2496_v56  ;;  %v3456_v53 = vld [vmem:[#allocation24_spill] sm:$0xff]  ;;  %v3457_v56 = vld [vmem:[#allocation25_spill] sm:$0xff] }
 0x3c1   :  { %1293 = vmatpush.msrb.mxu0 %v2500_v62  ;;  %1313 = vmatpush.msrb.mxu1 %v2502_v3  ;;  %v3458_v62 = vld [vmem:[#allocation33_spill] sm:$0xff] }
 0x3c2   :  { %1333 = vmatpush.msra.mxu2 %v2504_v0  ;;  %1353 = vmatpush.msra.mxu3 %v2508_v2  ;;  %v952_v3 = vrot.slane %v3458_v62, 6  ;;  %v3459_v0 = vld [vmem:[#allocation38_spill] sm:$0xff]  ;;  %v1120_v13 = vrot.slane %v3458_v62, 7 }
 0x3c3   :  { %1294 = vmatpush.msrb.mxu0 %v2512_v61  ;;  %1314 = vmatpush.msrb.mxu1 %v2514_v14  ;;  %v953_v2 = vrot.slane %v3459_v0, 6  ;;  %v1121_v26 = vrot.slane %v3459_v0, 7  ;;  %v2879_v62 = vld [vmem:[#allocation4 + $0x1d8] sm:$0xff]  ;;  %v2885_v0 = vld [vmem:[#allocation4 + $0x1a8] sm:$0xff] }
 0x3c4   :  { %1334 = vmatpush.msra.mxu2 %v2516_v7  ;;  %1354 = vmatpush.msra.mxu3 %v2520_v5 }
 0x3c5   :  { %1295 = vmatpush.msrb.mxu0 %v2524_v1  ;;  %1315 = vmatpush.msrb.mxu1 %v2526_v55  ;;  %v954_v1 = vrot.slane %v3435_v25, 6 }
 0x3c6   :  { %1335 = vmatpush.msra.mxu2 %v2528_v60  ;;  %1355 = vmatpush.msra.mxu3 %v2532_v39  ;;  %v3460_v60 = vld [vmem:[#allocation39_spill] sm:$0xff] }
 0x3c7   :  { %1296 = vmatpush.msrb.mxu0 %v2536_v9  ;;  %1316 = vmatpush.msrb.mxu1 %v2538_v4  ;;  %v955_v39 = vrot.slane %v3460_v60, 6  ;;  %v1123_v31 = vrot.slane %v3460_v60, 7  ;;  %v2909_v60 = vld [vmem:[#allocation4 + $0x168] sm:$0xff] }
 0x3c8   :  { %1336 = vmatpush.msra.mxu2 %v2540_v48  ;;  %1356 = vmatpush.msra.mxu3 %v2544_v63 }
 0x3c9   :  { %1297 = vmatpush.msrb.mxu0 %v2548_v10  ;;  %1317 = vmatpush.msrb.mxu1 %v2550_v11 }
 0x3ca   :  { %1337 = vmatpush.msra.mxu2 %v2552_v12  ;;  %1357 = vmatpush.msra.mxu3 %v2556_v15 }
 0x3cb   :  { %1298 = vmatpush.msrb.mxu0 %v2560_v16  ;;  %1318 = vmatpush.msrb.mxu1 %v2562_v17 }
 0x3cc   :  { %1338 = vmatpush.msra.mxu2 %v2564_v18  ;;  %1358 = vmatpush.msra.mxu3 %v2568_v19 }
 0x3cd   :  { %1299 = vmatpush.msrb.mxu0 %v3438_v58  ;;  %1319 = vmatpush.msrb.mxu1 %v3439_v6 }
 0x3ce   :  { %1339 = vmatpush.msra.mxu2 %v3440_v57  ;;  %1359 = vmatpush.msra.mxu3 %v3441_v54 }
 0x3cf   :  { %1300 = vmatpush.msrb.mxu0 %v3442_v37  ;;  %1320 = vmatpush.msrb.mxu1 %v3443_v38 }
 0x3d0   :  { %1340 = vmatpush.msra.mxu2 %v3444_v40  ;;  %1360 = vmatpush.msra.mxu3 %v3445_v41 }
 0x3d1   :  { %1301 = vmatpush.msrb.mxu0 %v3446_v42  ;;  %1321 = vmatpush.msrb.mxu1 %v3447_v43 }
 0x3d2   :  { %1341 = vmatpush.msra.mxu2 %v3448_v44  ;;  %1361 = vmatpush.msra.mxu3 %v3449_v45 }
 0x3d3   :  { %1302 = vmatpush.msrb.mxu0 %v3450_v46  ;;  %1322 = vmatpush.msrb.mxu1 %v3451_v47 }
 0x3d4   :  { %1342 = vmatpush.msra.mxu2 %v3452_v49  ;;  %1362 = vmatpush.msra.mxu3 %v3453_v50 }
 0x3d5   :  { %1303 = vmatpush.msrb.mxu0 %v3454_v51  ;;  %1323 = vmatpush.msrb.mxu1 %v3455_v52  ;;  %v2871_v52 = vld [vmem:[#allocation4 + $0x1c0] sm:$0xff] }
 0x3d6   :  { %1343 = vmatpush.msra.mxu2 %v3456_v53  ;;  %1363 = vmatpush.msra.mxu3 %v3457_v56  ;;  %v2873_v53 = vld [vmem:[#allocation4 + $0x1c8] sm:$0xff]  ;;  %v2875_v56 = vld [vmem:[#allocation4 + $0x1d0] sm:$0xff] }
 0x432   :  { %v977_v61 = vpop.f32.mrf.mxu0  ;;  %v997_v14 = vpop.f32.mrf.mxu1 }
 0x433   :  { %v978_v7 = vadd.f32 %v977_v61, %v952_v3  ;;  %v998_v5 = vadd.f32 %v997_v14, %v953_v2  ;;  %v2883_v3 = vld [vmem:[#allocation4 + $0x1a0] sm:$0xff]  ;;  %v2887_v2 = vld [vmem:[#allocation4 + $0x1b0] sm:$0xff]  ;;  %v2891_v61 = vld [vmem:[#allocation4 + $0x1b8] sm:$0xff] }
 0x434   :  { %v2895_v14 = vld [vmem:[#allocation4 + $0x180] sm:$0xff] }
 0x435   :  { %1832 = vtanh.f32 %v978_v7  ;;  %v2897_v7 = vld [vmem:[#allocation4 + $0x188] sm:$0xff] }
 0x436   :  { %1834 = vtanh.f32 %v998_v5  ;;  %v2899_v5 = vld [vmem:[#allocation4 + $0x190] sm:$0xff] }
 0x439   :  { %v1017_v55 = vpop.f32.mrf.mxu2  ;;  %v1037_v9 = vpop.f32.mrf.mxu3 }
 0x43a   :  { %v1018_v4 = vadd.f32 %v1017_v55, %v954_v1  ;;  %v1038_v63 = vadd.f32 %v1037_v9, %v955_v39  ;;  %v2903_v1 = vld [vmem:[#allocation4 + $0x198] sm:$0xff]  ;;  %v2907_v55 = vld [vmem:[#allocation4 + $0x160] sm:$0xff]  ;;  %v2911_v39 = vld [vmem:[#allocation4 + $0x170] sm:$0xff] }
 0x43b   :  { %v1833_v48 = vpop.eup %1832  ;;  %v2915_v9 = vld [vmem:[#allocation4 + $0x178] sm:$0xff] }
 0x43c   :  { %v1835_v10 = vpop.eup %1834  ;;  %1836 = vtanh.f32 %v1018_v4  ;;  %v1044_v11 = vmul.f32 0.5, %v1833_v48  ;;  %v2919_v4 = vld [vmem:[#allocation4 + $0x140] sm:$0xff]  ;;  %v2921_v48 = vld [vmem:[#allocation4 + $0x148] sm:$0xff] }
 0x43d   :  { %v1046_v12 = vmul.f32 0.5, %v1835_v10  ;;  %1838 = vtanh.f32 %v1038_v63  ;;  %v2923_v63 = vld [vmem:[#allocation4 + $0x150] sm:$0xff]  ;;  %v2927_v10 = vld [vmem:[#allocation4 + $0x158] sm:$0xff] }
 0x43e   :  { %v1045_v16 = vadd.f32 0.5, %v1044_v11  ;;  %v2931_v11 = vld [vmem:[#allocation4 + $0x120] sm:$0xff] }
 0x43f   :  { %v1047_v15 = vadd.f32 0.5, %v1046_v12  ;;  %v2933_v12 = vld [vmem:[#allocation4 + $0x128] sm:$0xff] }
 0x441   :  { %v1050_v18 = vmul.f32 %v1047_v15, %v2773_v8  ;;  %v2935_v15 = vld [vmem:[#allocation4 + $0x130] sm:$0xff] }
 0x442   :  { %v1837_v17 = vpop.eup %1836 }
 0x443   :  { %v1051_v19 = vmul.f32 %v1837_v17, %v1045_v16  ;;  %v1839_v20 = vpop.eup %1838  ;;  %v2939_v16 = vld [vmem:[#allocation4 + $0x138] sm:$0xff]  ;;  %v2943_v17 = vld [vmem:[#allocation4 + $0x100] sm:$0xff] }
 0x444   :  { %v1048_v22 = vmul.f32 0.5, %v1839_v20  ;;  %v2951_v20 = vld [vmem:[#allocation4 + $0x118] sm:$0xff] }
 0x445   :  { %v1052_v21 = vadd.f32 %v1051_v19, %v1050_v18  ;;  %v2945_v18 = vld [vmem:[#allocation4 + $0x108] sm:$0xff]  ;;  %v2947_v19 = vld [vmem:[#allocation4 + $0x110] sm:$0xff] }
 0x446   :  { %v1049_v23 = vadd.f32 0.5, %v1048_v22  ;;  %v2957_v22 = vld [vmem:[#allocation4 + $0xe8] sm:$0xff] }
 0x447   :  { %1840 = vtanh.f32 %v1052_v21 }
 0x44d   :  { %v1841_v28 = vpop.eup %1840 }
 0x44e   :  { %v1054_v32 = vmul.f32 %v1841_v28, %v1049_v23  ;;  %v2959_v23 = vld [vmem:[#allocation4 + $0xf0] sm:$0xff]  ;;  %v2963_v28 = vld [vmem:[#allocation4 + $0xf8] sm:$0xff] }
 0x450   :  { %1055 = vst [vmem:[#allocation2 + $0x3] sm:$0x1] %v1054_v32  ;;  %1144 = vmatmul.f32.vlgmr.msra.gmra.mxu0 %v1054_v32  ;;  %1164 = vmatmul.f32.vlgmr.msra.gmra.mxu1 %v1054_v32 }
 0x451   :  { %1184 = vmatmul.f32.vlgmr.msrb.gmra.mxu2 %v1054_v32  ;;  %1204 = vmatmul.f32.vlgmr.msrb.gmra.mxu3 %v1054_v32  ;;  %v2967_v32 = vld [vmem:[#allocation4 + $0xc0] sm:$0xff] }
 0x452   :  { %1451 = vmatpush.msra.mxu0 %v2847_v30  ;;  %1471 = vmatpush.msra.mxu1 %v2849_v35 }
 0x453   :  { %1491 = vmatpush.msrb.mxu2 %v2851_v29  ;;  %1511 = vmatpush.msrb.mxu3 %v2855_v24 }
 0x454   :  { %1452 = vmatpush.msra.mxu0 %v2871_v52  ;;  %1472 = vmatpush.msra.mxu1 %v2873_v53 }
 0x455   :  { %1492 = vmatpush.msrb.mxu2 %v2875_v56  ;;  %1512 = vmatpush.msrb.mxu3 %v2879_v62 }
 0x456   :  { %1453 = vmatpush.msra.mxu0 %v2883_v3  ;;  %1473 = vmatpush.msra.mxu1 %v2885_v0 }
 0x457   :  { %1493 = vmatpush.msrb.mxu2 %v2887_v2  ;;  %1513 = vmatpush.msrb.mxu3 %v2891_v61 }
 0x458   :  { %1454 = vmatpush.msra.mxu0 %v2895_v14  ;;  %1474 = vmatpush.msra.mxu1 %v2897_v7 }
 0x459   :  { %1494 = vmatpush.msrb.mxu2 %v2899_v5  ;;  %1514 = vmatpush.msrb.mxu3 %v2903_v1 }
 0x45a   :  { %1455 = vmatpush.msra.mxu0 %v2907_v55  ;;  %1475 = vmatpush.msra.mxu1 %v2909_v60 }
 0x45b   :  { %1495 = vmatpush.msrb.mxu2 %v2911_v39  ;;  %1515 = vmatpush.msrb.mxu3 %v2915_v9 }
 0x45c   :  { %1456 = vmatpush.msra.mxu0 %v2919_v4  ;;  %1476 = vmatpush.msra.mxu1 %v2921_v48 }
 0x45d   :  { %1496 = vmatpush.msrb.mxu2 %v2923_v63  ;;  %1516 = vmatpush.msrb.mxu3 %v2927_v10 }
 0x45e   :  { %1457 = vmatpush.msra.mxu0 %v2931_v11  ;;  %1477 = vmatpush.msra.mxu1 %v2933_v12 }
 0x45f   :  { %1497 = vmatpush.msrb.mxu2 %v2935_v15  ;;  %1517 = vmatpush.msrb.mxu3 %v2939_v16 }
 0x460   :  { %1458 = vmatpush.msra.mxu0 %v2943_v17  ;;  %1478 = vmatpush.msra.mxu1 %v2945_v18 }
 0x461   :  { %1498 = vmatpush.msrb.mxu2 %v2947_v19  ;;  %1518 = vmatpush.msrb.mxu3 %v2951_v20 }
 0x462   :  { %1479 = vmatpush.msra.mxu1 %v2957_v22 }
 0x463   :  { %1499 = vmatpush.msrb.mxu2 %v2959_v23  ;;  %1519 = vmatpush.msrb.mxu3 %v2963_v28 }
 0x4cd   :  { %v1145_v27 = vpop.f32.mrf.mxu0  ;;  %v1165_v34 = vpop.f32.mrf.mxu1 }
 0x4ce   :  { %v1146_v36 = vadd.f32 %v1145_v27, %v1120_v13  ;;  %v1166_v8 = vadd.f32 %v1165_v34, %v1121_v26  ;;  %v2969_v13 = vld [vmem:[#allocation4 + $0xc8] sm:$0xff]  ;;  %v2971_v26 = vld [vmem:[#allocation4 + $0xd0] sm:$0xff]  ;;  %v2975_v27 = vld [vmem:[#allocation4 + $0xd8] sm:$0xff] }
 0x4cf   :  { %1480 = vmatpush.msra.mxu1 %v2969_v13  ;;  %1500 = vmatpush.msrb.mxu2 %v2971_v26  ;;  %v2979_v34 = vld [vmem:[#allocation4 + $0xa0] sm:$0xff] }
 0x4d0   :  { %1842 = vtanh.f32 %v1146_v36  ;;  %1520 = vmatpush.msrb.mxu3 %v2975_v27  ;;  %v2981_v36 = vld [vmem:[#allocation4 + $0xa8] sm:$0xff] }
 0x4d1   :  { %1844 = vtanh.f32 %v1166_v8  ;;  %v2983_v8 = vld [vmem:[#allocation4 + $0xb0] sm:$0xff]  ;;  %1481 = vmatpush.msra.mxu1 %v2981_v36 }
 0x4d2   :  { %1501 = vmatpush.msrb.mxu2 %v2983_v8 }
 0x4d4   :  { %v1185_v59 = vpop.f32.mrf.mxu2  ;;  %v1205_v58 = vpop.f32.mrf.mxu3 }
 0x4d5   :  { %v1186_v6 = vadd.f32 %v1185_v59, %v1122_v33  ;;  %v1206_v54 = vadd.f32 %v1205_v58, %v1123_v31  ;;  %v2987_v33 = vld [vmem:[#allocation4 + $0xb8] sm:$0xff]  ;;  %v2991_v59 = vld [vmem:[#allocation4 + $0x80] sm:$0xff]  ;;  %v2993_v31 = vld [vmem:[#allocation4 + $0x88] sm:$0xff] }
 0x4d6   :  { %v1843_v57 = vpop.eup %1842  ;;  %1521 = vmatpush.msrb.mxu3 %v2987_v33  ;;  %v2995_v58 = vld [vmem:[#allocation4 + $0x90] sm:$0xff]  ;;  %1482 = vmatpush.msra.mxu1 %v2993_v31 }
 0x4d7   :  { %v1845_v37 = vpop.eup %1844  ;;  %1846 = vtanh.f32 %v1186_v6  ;;  %v1212_v38 = vmul.f32 0.5, %v1843_v57  ;;  %v2999_v6 = vld [vmem:[#allocation4 + $0x98] sm:$0xff]  ;;  %1502 = vmatpush.msrb.mxu2 %v2995_v58  ;;  %v3003_v57 = vld [vmem:[#allocation4 + $0x60] sm:$0xff] }
 0x4d8   :  { %v1214_v40 = vmul.f32 0.5, %v1845_v37  ;;  %1848 = vtanh.f32 %v1206_v54  ;;  %1522 = vmatpush.msrb.mxu3 %v2999_v6  ;;  %v3005_v54 = vld [vmem:[#allocation4 + $0x68] sm:$0xff]  ;;  %v3007_v37 = vld [vmem:[#allocation4 + $0x70] sm:$0xff] }
 0x4d9   :  { %v1213_v42 = vadd.f32 0.5, %v1212_v38  ;;  %1483 = vmatpush.msra.mxu1 %v3005_v54  ;;  %v3011_v38 = vld [vmem:[#allocation4 + $0x78] sm:$0xff]  ;;  %1503 = vmatpush.msrb.mxu2 %v3007_v37 }
 0x4da   :  { %v1215_v41 = vadd.f32 0.5, %v1214_v40  ;;  %1523 = vmatpush.msrb.mxu3 %v3011_v38  ;;  %v3015_v40 = vld [vmem:[#allocation4 + $0x40] sm:$0xff] }
 0x4db   :  { %3462 = vst [vmem:[#allocation29_spill] sm:$0xff] %v3015_v40 }
 0x4dc   :  { %v1218_v44 = vmul.f32 %v1215_v41, %v1052_v21  ;;  %v2955_v21 = vld [vmem:[#allocation4 + $0xe0] sm:$0xff]  ;;  %v3017_v41 = vld [vmem:[#allocation4 + $0x48] sm:$0xff] }
 0x4dd   :  { %v1847_v43 = vpop.eup %1846  ;;  %1459 = vmatpush.msra.mxu0 %v2955_v21  ;;  %3463 = vst [vmem:[#allocation30_spill] sm:$0xff] %v3017_v41  ;;  %1484 = vmatpush.msra.mxu1 %v3017_v41 }
 0x4de   :  { %v1219_v45 = vmul.f32 %v1847_v43, %v1213_v42  ;;  %v1849_v46 = vpop.eup %1848  ;;  %v3019_v42 = vld [vmem:[#allocation4 + $0x50] sm:$0xff]  ;;  %v3023_v43 = vld [vmem:[#allocation4 + $0x58] sm:$0xff] }
 0x4df   :  { %v1216_v25 = vmul.f32 0.5, %v1849_v46  ;;  %1460 = vmatpush.msra.mxu0 %v2967_v32  ;;  %3464 = vst [vmem:[#allocation31_spill] sm:$0xff] %v3019_v42  ;;  %1504 = vmatpush.msrb.mxu2 %v3019_v42  ;;  %v3031_v46 = vld [vmem:[#allocation4 + $0x30] sm:$0xff]  ;;  %v3469_v42 = vld [vmem:[#allocation28_spill] sm:$0xff] }
 0x4e0   :  { %v2861_v47 = vadd.f32 %v1219_v45, %v1218_v44  ;;  %3465 = vst [vmem:[#allocation32_spill] sm:$0xff] %v3023_v43  ;;  %1524 = vmatpush.msrb.mxu3 %v3023_v43  ;;  %v3027_v44 = vld [vmem:[#allocation4 + $0x20] sm:$0xff]  ;;  %v3029_v45 = vld [vmem:[#allocation4 + $0x28] sm:$0xff]  ;;  %v3045_v43 = vld [vmem:[#allocation4 + $0x18] sm:$0xff] }
 0x4e1   :  { %v1217_v49 = vadd.f32 0.5, %v1216_v25  ;;  %1461 = vmatpush.msra.mxu0 %v2979_v34  ;;  %3466 = vst [vmem:[#allocation37_spill] sm:$0xff] %v3027_v44  ;;  %1485 = vmatpush.msra.mxu1 %v3029_v45  ;;  %v3035_v25 = vld [vmem:[#allocation4 + $0x38] sm:$0xff] }
 0x4e2   :  { %1850 = vtanh.f32 %v2861_v47  ;;  %3467 = vst [vmem:[#allocation26_spill] sm:$0xff] %v3029_v45  ;;  %1505 = vmatpush.msrb.mxu2 %v3031_v46  ;;  %1525 = vmatpush.msrb.mxu3 %v3035_v25 }
 0x4e3   :  { %1462 = vmatpush.msra.mxu0 %v2991_v59  ;;  %3468 = vst [vmem:[#allocation7_spill] sm:$0xff] %v3031_v46 }
 0x4e4   :  { %1526 = vmatpush.msrb.mxu3 %v3045_v43 }
 0x4e5   :  { %1463 = vmatpush.msra.mxu0 %v3003_v57 }
 0x4e7   :  { %1464 = vmatpush.msra.mxu0 %v3015_v40  ;;  %v3470_v40 = vld [vmem:[#allocation35_spill] sm:$0xff] }
 0x4e8   :  { %v1851_v50 = vpop.eup %1850 }
 0x4e9   :  { %v2864_v51 = vmul.f32 %v1851_v50, %v1217_v49  ;;  %1465 = vmatpush.msra.mxu0 %v3027_v44  ;;  %v3037_v49 = vld [vmem:[#allocation4] sm:$0xff]  ;;  %v3039_v50 = vld [vmem:[#allocation4 + $0x8] sm:$0xff] }
 0x4ea   :  { %1486 = vmatpush.msra.mxu1 %v3039_v50 }
 0x4eb   :  { %3461 = vst [vmem:[#allocation27_spill] sm:$0xff] %v2864_v51  ;;  %1304 = vmatmul.f32.vlgmr.msrb.gmra.mxu0 %v2864_v51  ;;  %1324 = vmatmul.f32.vlgmr.msrb.gmra.mxu1 %v2864_v51 }
 0x4ec   :  { %1223 = vst [vmem:[#allocation2 + $0x4] sm:$0x1] %v2864_v51  ;;  %1344 = vmatmul.f32.vlgmr.msra.gmra.mxu2 %v2864_v51  ;;  %1364 = vmatmul.f32.vlgmr.msra.gmra.mxu3 %v2864_v51  ;;  %v3043_v51 = vld [vmem:[#allocation4 + $0x10] sm:$0xff] }
 0x4ed   :  { %1466 = vmatpush.msra.mxu0 %v3037_v49  ;;  %1506 = vmatpush.msrb.mxu2 %v3043_v51 }
 0x4ee   :  { %1634 = vmatpush.msrb.mxu1 %v2849_v35  ;;  %1674 = vmatpush.msra.mxu3 %v2855_v24 }
 0x4ef   :  { %1614 = vmatpush.msrb.mxu0 %v2847_v30  ;;  %1654 = vmatpush.msra.mxu2 %v2851_v29  ;;  %v3471_v29 = vld [vmem:[#allocation34_spill] sm:$0xff] }
 0x4f0   :  { %1635 = vmatpush.msrb.mxu1 %v2873_v53  ;;  %1675 = vmatpush.msra.mxu3 %v2879_v62  ;;  %v3472_v53 = vld [vmem:[#allocation36_spill] sm:$0xff] }
 0x4f1   :  { %1615 = vmatpush.msrb.mxu0 %v2871_v52  ;;  %1655 = vmatpush.msra.mxu2 %v2875_v56 }
 0x4f2   :  { %1636 = vmatpush.msrb.mxu1 %v2885_v0  ;;  %1676 = vmatpush.msra.mxu3 %v2891_v61 }
 0x4f3   :  { %1616 = vmatpush.msrb.mxu0 %v2883_v3  ;;  %1656 = vmatpush.msra.mxu2 %v2887_v2 }
 0x4f4   :  { %1637 = vmatpush.msrb.mxu1 %v2897_v7  ;;  %1677 = vmatpush.msra.mxu3 %v2903_v1  ;;  %v3473_v1 = vld [vmem:[#allocation40_spill] sm:$0xff] }
 0x4f5   :  { %1617 = vmatpush.msrb.mxu0 %v2895_v14  ;;  %1657 = vmatpush.msra.mxu2 %v2899_v5  ;;  %vm1383_vm4 = vcmp.ge.s32.totalorder %v3473_v1, 32  ;;  %vm1546_vm5 = vcmp.ge.s32.totalorder %v3473_v1, 64  ;;  %vm1709_vm6 = vcmp.ge.s32.totalorder %v3473_v1, 96 }
 0x4f6   :  { %1638 = vmatpush.msrb.mxu1 %v2909_v60  ;;  %1678 = vmatpush.msra.mxu3 %v2915_v9 }
 0x4f7   :  { %1618 = vmatpush.msrb.mxu0 %v2907_v55  ;;  %1658 = vmatpush.msra.mxu2 %v2911_v39 }
 0x4f8   :  { %1639 = vmatpush.msrb.mxu1 %v2921_v48  ;;  %1679 = vmatpush.msra.mxu3 %v2927_v10  ;;  %v3474_v48 = vld [vmem:[#allocation29_spill] sm:$0xff] }
 0x4f9   :  { %1619 = vmatpush.msrb.mxu0 %v2919_v4  ;;  %1659 = vmatpush.msra.mxu2 %v2923_v63  ;;  %v3475_v63 = vld [vmem:[#allocation30_spill] sm:$0xff] }
 0x4fa   :  { %1640 = vmatpush.msrb.mxu1 %v2933_v12  ;;  %1680 = vmatpush.msra.mxu3 %v2939_v16  ;;  %v3477_v12 = vld [vmem:[#allocation32_spill] sm:$0xff]  ;;  %v3479_v16 = vld [vmem:[#allocation26_spill] sm:$0xff] }
 0x4fb   :  { %1620 = vmatpush.msrb.mxu0 %v2931_v11  ;;  %1660 = vmatpush.msra.mxu2 %v2935_v15  ;;  %v3476_v11 = vld [vmem:[#allocation31_spill] sm:$0xff]  ;;  %v3478_v15 = vld [vmem:[#allocation37_spill] sm:$0xff] }
 0x4fc   :  { %1641 = vmatpush.msrb.mxu1 %v2945_v18  ;;  %1681 = vmatpush.msra.mxu3 %v2951_v20 }
 0x4fd   :  { %1621 = vmatpush.msrb.mxu0 %v2943_v17  ;;  %1661 = vmatpush.msra.mxu2 %v2947_v19  ;;  %v3480_v17 = vld [vmem:[#allocation27_spill] sm:$0xff] }
 0x4fe   :  { %1642 = vmatpush.msrb.mxu1 %v2957_v22  ;;  %1682 = vmatpush.msra.mxu3 %v2963_v28  ;;  %v3481_v19 = vld [vmem:[#allocation7_spill] sm:$0xff] }
 0x4ff   :  { %1622 = vmatpush.msrb.mxu0 %v2955_v21  ;;  %1662 = vmatpush.msra.mxu2 %v2959_v23 }
 0x500   :  { %1643 = vmatpush.msrb.mxu1 %v2969_v13  ;;  %1683 = vmatpush.msra.mxu3 %v2975_v27 }
 0x501   :  { %1623 = vmatpush.msrb.mxu0 %v2967_v32  ;;  %1663 = vmatpush.msra.mxu2 %v2971_v26 }
 0x502   :  { %1644 = vmatpush.msrb.mxu1 %v2981_v36  ;;  %1684 = vmatpush.msra.mxu3 %v2987_v33 }
 0x503   :  { %1624 = vmatpush.msrb.mxu0 %v2979_v34  ;;  %1664 = vmatpush.msra.mxu2 %v2983_v8 }
 0x504   :  { %1645 = vmatpush.msrb.mxu1 %v2993_v31  ;;  %1685 = vmatpush.msra.mxu3 %v2999_v6 }
 0x505   :  { %1625 = vmatpush.msrb.mxu0 %v2991_v59  ;;  %1665 = vmatpush.msra.mxu2 %v2995_v58 }
 0x506   :  { %1646 = vmatpush.msrb.mxu1 %v3005_v54  ;;  %1686 = vmatpush.msra.mxu3 %v3011_v38 }
 0x507   :  { %1626 = vmatpush.msrb.mxu0 %v3003_v57  ;;  %1666 = vmatpush.msra.mxu2 %v3007_v37 }
 0x508   :  { %1647 = vmatpush.msrb.mxu1 %v3475_v63  ;;  %1687 = vmatpush.msra.mxu3 %v3477_v12 }
 0x509   :  { %1627 = vmatpush.msrb.mxu0 %v3474_v48  ;;  %1667 = vmatpush.msra.mxu2 %v3476_v11 }
 0x50a   :  { %1648 = vmatpush.msrb.mxu1 %v3479_v16  ;;  %1688 = vmatpush.msra.mxu3 %v3035_v25  ;;  %v1726_v25 = vld [vmem:[%s3200_s4 + $0x68] sm:$0xff] }
 0x50b   :  { %1628 = vmatpush.msrb.mxu0 %v3478_v15  ;;  %1668 = vmatpush.msra.mxu2 %v3481_v19 }
 0x50c   :  { %1649 = vmatpush.msrb.mxu1 %v3039_v50  ;;  %1689 = vmatpush.msra.mxu3 %v3045_v43  ;;  %v1724_v50 = vld [vmem:[%s3200_s4 + $0x58] sm:$0xff] }
 0x50d   :  { %1629 = vmatpush.msrb.mxu0 %v3037_v49  ;;  %1669 = vmatpush.msra.mxu2 %v3043_v51  ;;  %v1725_v49 = vld [vmem:[%s3200_s4 + $0x60] sm:$0xff] }
 0x568   :  { %v1305_v44 = vpop.f32.mrf.mxu0  ;;  %v1325_v45 = vpop.f32.mrf.mxu1 }
 0x569   :  { %v1306_v41 = vadd.f32 %v1305_v44, %v3469_v42  ;;  %v1326_v46 = vadd.f32 %v1325_v45, %v3470_v40  ;;  %v1728_v45 = vld [vmem:[%s3200_s4 + $0x78] sm:$0xff] }
 0x56b   :  { %1852 = vtanh.f32 %v1306_v41 }
 0x56c   :  { %1854 = vtanh.f32 %v1326_v46  ;;  %v1727_v46 = vld [vmem:[%s3200_s4 + $0x70] sm:$0xff] }
 0x56f   :  { %v1345_v30 = vpop.f32.mrf.mxu2  ;;  %v1365_v35 = vpop.f32.mrf.mxu3 }
 0x570   :  { %v1346_v24 = vadd.f32 %v1345_v30, %v3471_v29  ;;  %v1366_v56 = vadd.f32 %v1365_v35, %v3472_v53  ;;  %v1723_v30 = vld [vmem:[%s3200_s4 + $0x50] sm:$0xff]  ;;  %v1722_v35 = vld [vmem:[%s3200_s4 + $0x48] sm:$0xff] }
 0x571   :  { %v1853_v52 = vpop.eup %1852 }
 0x572   :  { %v1855_v62 = vpop.eup %1854  ;;  %1856 = vtanh.f32 %v1346_v24  ;;  %v1372_v3 = vmul.f32 0.5, %v1853_v52  ;;  %v1721_v24 = vld [vmem:[%s3200_s4 + $0x40] sm:$0xff]  ;;  %v1720_v52 = vld [vmem:[%s3200_s4 + $0x38] sm:$0xff] }
 0x573   :  { %v1374_v0 = vmul.f32 0.5, %v1855_v62  ;;  %1858 = vtanh.f32 %v1366_v56  ;;  %v1719_v56 = vld [vmem:[%s3200_s4 + $0x30] sm:$0xff]  ;;  %v1718_v62 = vld [vmem:[%s3200_s4 + $0x28] sm:$0xff] }
 0x574   :  { %v1373_v61 = vadd.f32 0.5, %v1372_v3  ;;  %v1717_v3 = vld [vmem:[%s3200_s4 + $0x20] sm:$0xff] }
 0x575   :  { %v1375_v2 = vadd.f32 0.5, %v1374_v0  ;;  %v1716_v0 = vld [vmem:[%s3200_s4 + $0x18] sm:$0xff] }
 0x577   :  { %v1378_v7 = vmul.f32 %v1375_v2, %v2861_v47 }
 0x578   :  { %v1857_v14 = vpop.eup %1856 }
 0x579   :  { %v1379_v5 = vmul.f32 %v1857_v14, %v1373_v61  ;;  %v1859_v55 = vpop.eup %1858  ;;  %v1715_v14 = vld [vmem:[%s3200_s4 + $0x10] sm:$0xff] }
 0x57a   :  { %v1376_v9 = vmul.f32 0.5, %v1859_v55  ;;  %v1714_v55 = vld [vmem:[%s3200_s4 + $0x8] sm:$0xff] }
 0x57b   :  { %v1380_v60 = vadd.f32 %v1379_v5, %v1378_v7 }
 0x57d   :  { %1860 = vtanh.f32 %v1380_v60  ;;  %v1384_v39 = vsel %vm1383_vm4, %v1380_v60, %v2861_v47  ;;  %v1377_v47 = vadd.f32 0.5, %v1376_v9  ;;  %v1713_v60 = vld [vmem:[%s3200_s4] sm:$0xff] }
 0x583   :  { %v1861_v4 = vpop.eup %1860 }
 0x584   :  { %v1382_v10 = vmul.f32 %v1861_v4, %v1377_v47 }
 0x586   :  { %v1385_v18 = vsel %vm1383_vm4, %v1382_v10, %v3480_v17 }
 0x587   :  { %1386 = vst [vmem:[#allocation2 + $0x5] sm:$0x1] %v1385_v18  ;;  %1467 = vmatmul.f32.vlgmr.msra.gmra.mxu0 %v1385_v18  ;;  %1487 = vmatmul.f32.vlgmr.msra.gmra.mxu1 %v1385_v18 }
 0x588   :  { %1507 = vmatmul.f32.vlgmr.msrb.gmra.mxu2 %v1385_v18  ;;  %1527 = vmatmul.f32.vlgmr.msrb.gmra.mxu3 %v1385_v18 }
 0x589   :  { %1733 = vmatpush.msra.mxu0 %v1728_v45 }
 0x58b   :  { %1734 = vmatpush.msra.mxu0 %v1727_v46 }
 0x58d   :  { %1735 = vmatpush.msra.mxu0 %v1726_v25 }
 0x58f   :  { %1736 = vmatpush.msra.mxu0 %v1725_v49 }
 0x591   :  { %1737 = vmatpush.msra.mxu0 %v1724_v50 }
 0x593   :  { %1738 = vmatpush.msra.mxu0 %v1723_v30 }
 0x595   :  { %1739 = vmatpush.msra.mxu0 %v1722_v35 }
 0x597   :  { %1740 = vmatpush.msra.mxu0 %v1721_v24 }
 0x599   :  { %1741 = vmatpush.msra.mxu0 %v1720_v52 }
 0x59b   :  { %1742 = vmatpush.msra.mxu0 %v1719_v56 }
 0x59d   :  { %1743 = vmatpush.msra.mxu0 %v1718_v62 }
 0x59f   :  { %1744 = vmatpush.msra.mxu0 %v1717_v3 }
 0x5a1   :  { %1745 = vmatpush.msra.mxu0 %v1716_v0 }
 0x5a3   :  { %1746 = vmatpush.msra.mxu0 %v1715_v14 }
 0x5a5   :  { %1747 = vmatpush.msra.mxu0 %v1714_v55 }
 0x5a7   :  { %1748 = vmatpush.msra.mxu0 %v1713_v60 }
 0x604   :  { %v1468_v20 = vpop.f32.mrf.mxu0  ;;  %v1488_v21 = vpop.f32.mrf.mxu1 }
 0x605   :  { %v1469_v22 = vadd.f32 %v1468_v20, %v3469_v42  ;;  %v1489_v23 = vadd.f32 %v1488_v21, %v3470_v40 }
 0x607   :  { %1862 = vtanh.f32 %v1469_v22 }
 0x608   :  { %1864 = vtanh.f32 %v1489_v23  ;;  %v1771_v23 = vld [vmem:[#allocation3] ss:$0 sm:$0xff] }
 0x60b   :  { %v1508_v28 = vpop.f32.mrf.mxu2  ;;  %v1528_v32 = vpop.f32.mrf.mxu3 }
 0x60c   :  { %v1509_v13 = vadd.f32 %v1508_v28, %v3471_v29  ;;  %v1529_v27 = vadd.f32 %v1528_v32, %v3472_v53 }
 0x60d   :  { %v1863_v26 = vpop.eup %1862 }
 0x60e   :  { %v1865_v34 = vpop.eup %1864  ;;  %1866 = vtanh.f32 %v1509_v13  ;;  %v1535_v51 = vmul.f32 0.5, %v1863_v26 }
 0x60f   :  { %v1537_v36 = vmul.f32 0.5, %v1865_v34  ;;  %1868 = vtanh.f32 %v1529_v27 }
 0x610   :  { %v1536_v33 = vadd.f32 0.5, %v1535_v51 }
 0x611   :  { %v1538_v8 = vadd.f32 0.5, %v1537_v36 }
 0x613   :  { %v1541_v31 = vmul.f32 %v1538_v8, %v1384_v39 }
 0x614   :  { %v1867_v59 = vpop.eup %1866 }
 0x615   :  { %v1542_v58 = vmul.f32 %v1867_v59, %v1536_v33  ;;  %v1869_v6 = vpop.eup %1868 }
 0x616   :  { %v1539_v37 = vmul.f32 0.5, %v1869_v6 }
 0x617   :  { %v1543_v57 = vadd.f32 %v1542_v58, %v1541_v31 }
 0x618   :  { %v1540_v38 = vadd.f32 0.5, %v1539_v37 }
 0x619   :  { %1870 = vtanh.f32 %v1543_v57  ;;  %v1547_v54 = vsel %vm1546_vm5, %v1543_v57, %v1384_v39 }
 0x61f   :  { %v1871_v41 = vpop.eup %1870 }
 0x620   :  { %v1545_v43 = vmul.f32 %v1871_v41, %v1540_v38 }
 0x622   :  { %v3132_v44 = vsel %vm1546_vm5, %v1545_v43, %v1385_v18 }
 0x623   :  { %1549 = vst [vmem:[#allocation2 + $0x6] sm:$0x1] %v3132_v44  ;;  %1630 = vmatmul.f32.vlgmr.msrb.gmra.mxu0 %v3132_v44  ;;  %1650 = vmatmul.f32.vlgmr.msrb.gmra.mxu1 %v3132_v44 }
 0x624   :  { %1670 = vmatmul.f32.vlgmr.msra.gmra.mxu2 %v3132_v44  ;;  %1690 = vmatmul.f32.vlgmr.msra.gmra.mxu3 %v3132_v44 }
 0x6a0   :  { %v1631_v2 = vpop.f32.mrf.mxu0  ;;  %v1651_v61 = vpop.f32.mrf.mxu1 }
 0x6a1   :  { %v1632_v7 = vadd.f32 %v1631_v2, %v3469_v42  ;;  %v1652_v5 = vadd.f32 %v1651_v61, %v3470_v40 }
 0x6a3   :  { %1872 = vtanh.f32 %v1632_v7 }
 0x6a4   :  { %1874 = vtanh.f32 %v1652_v5 }
 0x6a7   :  { %v1671_v39 = vpop.f32.mrf.mxu2  ;;  %v1691_v9 = vpop.f32.mrf.mxu3 }
 0x6a8   :  { %v1672_v42 = vadd.f32 %v1671_v39, %v3471_v29  ;;  %v1692_v40 = vadd.f32 %v1691_v9, %v3472_v53 }
 0x6a9   :  { %v1873_v47 = vpop.eup %1872 }
 0x6aa   :  { %v1875_v4 = vpop.eup %1874  ;;  %1876 = vtanh.f32 %v1672_v42  ;;  %v1698_v48 = vmul.f32 0.5, %v1873_v47 }
 0x6ab   :  { %v1700_v63 = vmul.f32 0.5, %v1875_v4  ;;  %1878 = vtanh.f32 %v1692_v40 }
 0x6ac   :  { %v1699_v11 = vadd.f32 0.5, %v1698_v48 }
 0x6ad   :  { %v1701_v10 = vadd.f32 0.5, %v1700_v63 }
 0x6af   :  { %v1704_v15 = vmul.f32 %v1701_v10, %v1547_v54 }
 0x6b0   :  { %v1877_v12 = vpop.eup %1876 }
 0x6b1   :  { %v1705_v16 = vmul.f32 %v1877_v12, %v1699_v11  ;;  %v1879_v17 = vpop.eup %1878 }
 0x6b2   :  { %v1702_v19 = vmul.f32 0.5, %v1879_v17 }
 0x6b3   :  { %v1706_v18 = vadd.f32 %v1705_v16, %v1704_v15 }
 0x6b4   :  { %v1703_v20 = vadd.f32 0.5, %v1702_v19 }
 0x6b5   :  { %1880 = vtanh.f32 %v1706_v18 }
 0x6bb   :  { %v1881_v21 = vpop.eup %1880 }
 0x6bc   :  { %v1708_v29 = vmul.f32 %v1881_v21, %v1703_v20 }
 0x6be   :  { %v1710_v53 = vsel %vm1709_vm6, %v1708_v29, %v3132_v44 }
 0x6bf   :  { %1711 = vst [vmem:[#allocation2 + $0x7] sm:$0x1] %v1710_v53 }
 0x6c6   :  { %v1712_v22 = vld [vmem:[#allocation2] sm:$0xff] }
 0x6c7   :  { %1749 = vmatmul.f32.vlgmr.msra.gmra.mxu0 %v1712_v22 }
 0x744   :  { %v1750_v28 = vpop.f32.mrf.mxu0 }
 0x745   :  { %v1751_v32 = vadd.f32 %v1771_v23, %v1750_v28 }
 0x747   :  { %1754 = vst.msk [vmem:[%s3202_s6] sm:$0xff] %vm1753_vm7, %v1751_v32 }
 0x748   :  { %1759 = vsyncpa [#allocation5], 1 }

</bundles_post_ra>
